<compile_context>
chip_gen: v7x
topology: tpu7x:2x2x1
jax: 0.10.0
libtpu: 0.0.40
codegen_flags: <defaults>
</compile_context>

<pallas_src>
import functools

import jax
import jax.numpy as jnp
import numpy as np
from jax.experimental import pallas as pl
from jax.experimental.pallas import tpu as pltpu

OUT_PAD = 128   # lane-pad for the predictor output (sliced back to 10 outside)
_SUB = 8        # f32 sublane width


def _round_up(n, m):
    return ((n + m - 1) // m) * m


# --------------------------------------------------------------------------
# Fused kernel: embedding gather + all LSTM layers + folded head.  Gridless.
# --------------------------------------------------------------------------
def fused_lstm_kernel(idx_ref, pk_ref, wr_ref, o_ref, *, T, B, V, D, H,
                      n_lstm, r_bias, r_headw, r_headb, out_pad):
    """Operands:
      idx_ref : (T*B, 1) int32 token ids (batch padded to sublane width)
      pk_ref  : f32 pack  rows [0:V)=embedding (cols :D), [r_bias+l]=LSTM bias l,
                [r_headw:r_headw+H)=folded head weight, [r_headb]=folded head bias
      wr_ref  : bf16 pack rows [0:D)=W_ih0^T, [D:D+H)=W_hh0^T,
                then per layer l>=1: [W_ih_l^T ; W_hh_l^T] (2H rows)
      o_ref   : (B, out_pad) f32 output (lane-dense unmasked store)
    """
    H4 = 4 * H
    TB = T * B

    # ---- Embedding gather inside the kernel: exact one-hot @ table on the MXU
    idx = idx_ref[...]                                              # (T*B, 1) i32
    iota = jax.lax.broadcasted_iota(jnp.int32, (TB, V), 1)
    onehot = (idx == iota).astype(jnp.float32)                      # (T*B, V)
    emb_tbl = pk_ref[:V, :D]                                        # (V, D) f32
    x = jnp.dot(onehot, emb_tbl, preferred_element_type=jnp.float32)  # exact gather
    x = x.astype(jnp.bfloat16)

    # ---- Static views out of the two packed operands (one-time loads) ----
    w_ih0 = wr_ref[:D, :H4]                                         # (D, 4H) bf16
    w_hh0 = wr_ref[D:D + H, :H4]                                    # (H, 4H) bf16
    w_stk = []
    row = D + H
    for _ in range(1, n_lstm):
        w_stk.append(wr_ref[row:row + 2 * H, :H4])                  # (2H, 4H) bf16
        row += 2 * H
    b = [pk_ref[r_bias + li:r_bias + li + 1, :H4] for li in range(n_lstm)]

    # ---- Layer-0 input projection hoisted: ONE GEMM over all timesteps ----
    xg0 = jnp.dot(x, w_ih0, preferred_element_type=jnp.float32) + b[0]   # (T*B, 4H)

    def lstm_cell(gates, c_prev):
        # One full-vreg sigmoid + one full-vreg tanh per step; gate order is
        # PyTorch's [i | f | g | o], so the i-gate slice is at lane offset 0
        # and already aligned with the carried c/h.
        s = jax.nn.sigmoid(gates)                                   # (B, 4H)
        th = jnp.tanh(gates)
        i_g = s[:, 0 * H:1 * H]
        f_g = s[:, 1 * H:2 * H]
        g_g = th[:, 2 * H:3 * H]
        o_g = s[:, 3 * H:4 * H]
        c_new = f_g * c_prev + i_g * g_g
        h_new = o_g * jnp.tanh(c_new)
        return h_new, c_new

    h = [jnp.zeros((B, H), jnp.float32) for _ in range(n_lstm)]
    c = [jnp.zeros((B, H), jnp.float32) for _ in range(n_lstm)]

    # ---- Wavefronted recurrence: all layers advance inside one unrolled step,
    #      single basic block, so layer l step t overlaps layer l-1 step t+1.
    for t in range(T):
        g0 = xg0[t * B:(t + 1) * B, :] + jnp.dot(
            h[0].astype(jnp.bfloat16), w_hh0, preferred_element_type=jnp.float32)
        h[0], c[0] = lstm_cell(g0, c[0])
        for li in range(1, n_lstm):
            hin = jnp.concatenate([h[li - 1], h[li]], axis=1).astype(jnp.bfloat16)
            g = jnp.dot(hin, w_stk[li - 1],
                        preferred_element_type=jnp.float32) + b[li]    # K=2H matmul
            h[li], c[li] = lstm_cell(g, c[li])

    # ---- Folded (num_linear x Linear + predictor) head: ONE f32 matmul ----
    feat = h[n_lstm - 1]                           # hdn[-1]; dropout = id (eval)
    w_head = pk_ref[r_headw:r_headw + H, :out_pad]                  # (H, out_pad)
    b_head = pk_ref[r_headb:r_headb + 1, :out_pad]                  # (1, out_pad)
    o_ref[...] = jnp.dot(feat, w_head, preferred_element_type=jnp.float32) + b_head


# --------------------------------------------------------------------------
# One-time parameter preparation (transpose / stack / fold / pad / cast)
# --------------------------------------------------------------------------
def prepare_params(params, out_pad=OUT_PAD):
    emb = params["embedding"].astype(jnp.float32)          # (V, D)
    V, D = emb.shape
    lstm = params["lstm"]
    n_lstm = len(lstm)
    H = lstm[0]["w_hh"].shape[1]
    H4 = 4 * H
    out_dim = params["w_pred"].shape[0]
    assert out_dim <= out_pad

    # Fold the activation-free Linear(H,H) stack + predictor into one matmul.
    w_acc = jnp.eye(H, dtype=jnp.float32)
    b_acc = jnp.zeros((1, H), jnp.float32)
    for (w, bb) in params["linears"]:
        w_acc = w_acc @ w.T
        b_acc = b_acc @ w.T + bb
    w_head = w_acc @ params["w_pred"].T                                  # (H, out_dim)
    b_head = b_acc @ params["w_pred"].T + params["b_pred"]               # (1, out_dim)

    # f32 pack: embedding | LSTM biases | folded head weight | head bias.
    cols = max(H4, out_pad, D)
    r_bias = _round_up(V, _SUB)
    r_headw = _round_up(r_bias + n_lstm, _SUB)
    r_headb = _round_up(r_headw + H, _SUB)
    n_rows = _round_up(r_headb + 1, _SUB)
    pk = jnp.zeros((n_rows, cols), jnp.float32)
    pk = pk.at[:V, :D].set(emb)
    for li, layer in enumerate(lstm):
        pk = pk.at[r_bias + li, :H4].set(layer["b"][0])
    pk = pk.at[r_headw:r_headw + H, :out_dim].set(w_head)
    pk = pk.at[r_headb, :out_dim].set(b_head[0])

    # bf16 pack: W_ih0^T, W_hh0^T, then per layer>=1 the stacked [W_ih^T; W_hh^T].
    wr_rows = _round_up(D + H + 2 * H * (n_lstm - 1), 16)
    wr = jnp.zeros((wr_rows, H4), jnp.bfloat16)
    wr = wr.at[:D, :].set(lstm[0]["w_ih"].T.astype(jnp.bfloat16))
    wr = wr.at[D:D + H, :].set(lstm[0]["w_hh"].T.astype(jnp.bfloat16))
    row = D + H
    for li in range(1, n_lstm):
        wr = wr.at[row:row + H, :].set(lstm[li]["w_ih"].T.astype(jnp.bfloat16))
        wr = wr.at[row + H:row + 2 * H, :].set(lstm[li]["w_hh"].T.astype(jnp.bfloat16))
        row += 2 * H

    return dict(f32_pack=pk, bf16_pack=wr,
                V=V, D=D, H=H, n_lstm=n_lstm, out_dim=out_dim, out_pad=out_pad,
                r_bias=r_bias, r_headw=r_headw, r_headb=r_headb)


# --------------------------------------------------------------------------
# Forward pass
# --------------------------------------------------------------------------
def model_forward(seq, prepped):
    T, B = seq.shape
    B_pad = _round_up(B, _SUB)
    # Only per-call glue: pad the batch to the sublane width and flatten ids.
    idx = jnp.pad(seq.astype(jnp.int32), ((0, 0), (0, B_pad - B))).reshape(T * B_pad, 1)

    kernel = functools.partial(
        fused_lstm_kernel, T=T, B=B_pad, V=prepped["V"], D=prepped["D"],
        H=prepped["H"], n_lstm=prepped["n_lstm"], r_bias=prepped["r_bias"],
        r_headw=prepped["r_headw"], r_headb=prepped["r_headb"],
        out_pad=prepped["out_pad"])

    vmem = pltpu.MemorySpace.VMEM
    out = pl.pallas_call(
        kernel,
        out_shape=jax.ShapeDtypeStruct((B_pad, prepped["out_pad"]), jnp.float32),
        in_specs=[pl.BlockSpec(memory_space=vmem)] * 3,
        out_specs=pl.BlockSpec(memory_space=vmem),
    )(idx, prepped["f32_pack"], prepped["bf16_pack"])
    return out[:B, :prepped["out_dim"]]


# --------------------------------------------------------------------------
# Pure-JAX f32 reference (for correctness check)
# --------------------------------------------------------------------------
def ref_forward(seq, params):
    x = params["embedding"][seq]
    for layer in params["lstm"]:
        T, B, _ = x.shape
        H = layer["w_hh"].shape[1]
        h = jnp.zeros((B, H), jnp.float32)
        c = jnp.zeros((B, H), jnp.float32)
        outs = []
        for t in range(T):
            gates = x[t] @ layer["w_ih"].T + h @ layer["w_hh"].T + layer["b"][0]
            i_g = jax.nn.sigmoid(gates[:, 0 * H:1 * H])
            f_g = jax.nn.sigmoid(gates[:, 1 * H:2 * H])
            g_g = jnp.tanh(gates[:, 2 * H:3 * H])
            o_g = jax.nn.sigmoid(gates[:, 3 * H:4 * H])
            c = f_g * c + i_g * g_g
            h = o_g * jnp.tanh(c)
            outs.append(h)
        x = jnp.stack(outs, axis=0)
    feat = x[-1]
    for (w, b) in params["linears"]:
        feat = feat @ w.T + b[0]
    return feat @ params["w_pred"].T + params["b_pred"][0]


# --------------------------------------------------------------------------
# Deterministic parameter init (shapes follow the PyTorch module's __init__)
# --------------------------------------------------------------------------
def init_params(key, *, vocab_size, emb_dim, hidden_dim, num_lstm_layers,
                num_linear, num_classes=10):
    keys = jax.random.split(key, 3 + 4 * num_lstm_layers + 2 * num_linear + 2)
    kit = iter(keys)

    params = {}
    params["embedding"] = jax.random.normal(next(kit), (vocab_size, emb_dim),
                                            jnp.float32) * 0.1

    lstm = []
    in_dim = emb_dim
    for _ in range(num_lstm_layers):
        w_ih = jax.random.normal(next(kit), (4 * hidden_dim, in_dim),
                                 jnp.float32) * 0.1
        w_hh = jax.random.normal(next(kit), (4 * hidden_dim, hidden_dim),
                                 jnp.float32) * 0.1
        # PyTorch has b_ih and b_hh; their sum is what enters the gates.
        b_ih = jax.random.normal(next(kit), (4 * hidden_dim,), jnp.float32) * 0.05
        b_hh = jax.random.normal(next(kit), (4 * hidden_dim,), jnp.float32) * 0.05
        lstm.append({"w_ih": w_ih, "w_hh": w_hh,
                     "b": (b_ih + b_hh).reshape(1, 4 * hidden_dim)})
        in_dim = hidden_dim
    params["lstm"] = lstm

    linears = []
    for _ in range(num_linear):
        w = jax.random.normal(next(kit), (hidden_dim, hidden_dim),
                              jnp.float32) * 0.1
        b = jax.random.normal(next(kit), (hidden_dim,), jnp.float32) * 0.05
        linears.append((w, b.reshape(1, hidden_dim)))
    params["linears"] = linears

    params["w_pred"] = jax.random.normal(next(kit), (num_classes, hidden_dim),
                                         jnp.float32) * 0.1
    params["b_pred"] = (jax.random.normal(next(kit), (num_classes,),
                                          jnp.float32) * 0.05
                        ).reshape(1, num_classes)
    return params


if __name__ == "__main__":
    # Small config consistent with the module:
    #   vocab=64, embedding_dim=32, hidden_dim=32, num_lstm_layers=2,
    #   num_linear=2, seq_len=8, batch=2, 10 output classes.
    VOCAB, EMB, HID = 64, 32, 32
    NUM_LSTM_LAYERS, NUM_LINEAR = 2, 2
    SEQ_LEN, BATCH = 8, 2

    key = jax.random.PRNGKey(0)
    k_param, k_seq = jax.random.split(key)
    params = init_params(k_param, vocab_size=VOCAB, emb_dim=EMB,
                         hidden_dim=HID, num_lstm_layers=NUM_LSTM_LAYERS,
                         num_linear=NUM_LINEAR)
    prepped = prepare_params(params)                 # one-time weight prep

    seq = jax.random.randint(k_seq, (SEQ_LEN, BATCH), 0, VOCAB, dtype=jnp.int32)

    fwd = jax.jit(lambda s: model_forward(s, prepped))
    preds = jax.block_until_ready(fwd(seq))
    assert preds.shape == (BATCH, 10) and preds.dtype == jnp.float32

    ref = jax.block_until_ready(ref_forward(seq, params))
    np.testing.assert_allclose(np.asarray(preds), np.asarray(ref),
                               rtol=2e-3, atol=2e-3)

    print("KERNEL_OK")
</pallas_src>

<mosaic_0001>
module attributes {stable_mosaic.version = 11 : i64} {
  func.func @fused_lstm_kernel(%arg0: memref<64x1xi32, #tpu.memory_space<vmem>>, %arg1: memref<112x128xf32, #tpu.memory_space<vmem>>, %arg2: memref<128x128xbf16, #tpu.memory_space<vmem>>, %arg3: memref<8x128xf32, #tpu.memory_space<vmem>>) attributes {dimension_semantics = [], scalar_prefetch = 0 : i64, scratch_operands = 0 : i64, tpu.core_type = #tpu.core_type<tc>} {
    %c0 = arith.constant 0 : index
    %c0_0 = arith.constant 0 : index
    %0 = vector.load %arg0[%c0, %c0_0] : memref<64x1xi32, #tpu.memory_space<vmem>>, vector<64x1xi32>
    %1 = tpu.iota {dimensions = array<i32: 1>} : vector<64x64xi32>
    %2 = vector.broadcast %0 : vector<64x1xi32> to vector<64x64xi32>
    %3 = arith.cmpi eq, %2, %1 : vector<64x64xi32>
    %4 = arith.extui %3 : vector<64x64xi1> to vector<64x64xi32>
    %5 = arith.sitofp %4 : vector<64x64xi32> to vector<64x64xf32>
    %c0_1 = arith.constant 0 : index
    %c0_2 = arith.constant 0 : index
    %6 = vector.load %arg1[%c0_1, %c0_2] : memref<112x128xf32, #tpu.memory_space<vmem>>, vector<64x32xf32>
    %cst = arith.constant dense<0.000000e+00> : vector<64x32xf32>
    %7 = tpu.matmul %5, %6, %cst {dimension_numbers = #tpu.dot_dimension_numbers<[1], [0], [0], [1], [0, 0, 1, 1], [], []>} : vector<64x64xf32>, vector<64x32xf32>, vector<64x32xf32> -> vector<64x32xf32>
    %8 = arith.truncf %7 : vector<64x32xf32> to vector<64x32xbf16>
    %c0_3 = arith.constant 0 : index
    %c0_4 = arith.constant 0 : index
    %9 = vector.load %arg2[%c0_3, %c0_4] : memref<128x128xbf16, #tpu.memory_space<vmem>>, vector<32x128xbf16>
    %c32 = arith.constant 32 : index
    %c0_5 = arith.constant 0 : index
    %10 = vector.load %arg2[%c32, %c0_5] : memref<128x128xbf16, #tpu.memory_space<vmem>>, vector<32x128xbf16>
    %c64 = arith.constant 64 : index
    %c0_6 = arith.constant 0 : index
    %11 = vector.load %arg2[%c64, %c0_6] : memref<128x128xbf16, #tpu.memory_space<vmem>>, vector<64x128xbf16>
    %c64_7 = arith.constant 64 : index
    %c0_8 = arith.constant 0 : index
    %12 = vector.load %arg1[%c64_7, %c0_8] : memref<112x128xf32, #tpu.memory_space<vmem>>, vector<1x128xf32>
    %c65 = arith.constant 65 : index
    %c0_9 = arith.constant 0 : index
    %13 = vector.load %arg1[%c65, %c0_9] : memref<112x128xf32, #tpu.memory_space<vmem>>, vector<1x128xf32>
    %cst_10 = arith.constant dense<0.000000e+00> : vector<64x128xf32>
    %14 = tpu.matmul %8, %9, %cst_10 {dimension_numbers = #tpu.dot_dimension_numbers<[1], [0], [0], [1], [0, 0, 1, 1], [], []>} : vector<64x32xbf16>, vector<32x128xbf16>, vector<64x128xf32> -> vector<64x128xf32>
    %15 = vector.broadcast %12 : vector<1x128xf32> to vector<64x128xf32>
    %16 = arith.addf %14, %15 : vector<64x128xf32>
    %cst_11 = arith.constant 0.000000e+00 : f32
    %17 = vector.broadcast %cst_11 : f32 to vector<8x32xf32>
    %cst_12 = arith.constant 0.000000e+00 : f32
    %18 = vector.broadcast %cst_12 : f32 to vector<8x32xf32>
    %cst_13 = arith.constant 0.000000e+00 : f32
    %19 = vector.broadcast %cst_13 : f32 to vector<8x32xf32>
    %cst_14 = arith.constant 0.000000e+00 : f32
    %20 = vector.broadcast %cst_14 : f32 to vector<8x32xf32>
    %21 = vector.extract_strided_slice %16 {offsets = [0, 0], sizes = [8, 128], strides = [1, 1]} : vector<64x128xf32> to vector<8x128xf32>
    %22 = arith.truncf %17 : vector<8x32xf32> to vector<8x32xbf16>
    %cst_15 = arith.constant dense<0.000000e+00> : vector<8x128xf32>
    %23 = tpu.matmul %22, %10, %cst_15 {dimension_numbers = #tpu.dot_dimension_numbers<[1], [0], [0], [1], [0, 0, 1, 1], [], []>} : vector<8x32xbf16>, vector<32x128xbf16>, vector<8x128xf32> -> vector<8x128xf32>
    %24 = arith.addf %21, %23 : vector<8x128xf32>
    %25 = arith.negf %24 : vector<8x128xf32>
    %26 = math.exp %25 : vector<8x128xf32>
    %cst_16 = arith.constant 1.000000e+00 : f32
    %27 = vector.broadcast %cst_16 : f32 to vector<8x128xf32>
    %28 = arith.addf %27, %26 : vector<8x128xf32>
    %29 = arith.divf %27, %28 : vector<8x128xf32>
    %30 = math.tanh %24 : vector<8x128xf32>
    %31 = vector.extract_strided_slice %29 {offsets = [0, 0], sizes = [8, 32], strides = [1, 1]} : vector<8x128xf32> to vector<8x32xf32>
    %32 = vector.extract_strided_slice %29 {offsets = [0, 32], sizes = [8, 32], strides = [1, 1]} : vector<8x128xf32> to vector<8x32xf32>
    %33 = vector.extract_strided_slice %30 {offsets = [0, 64], sizes = [8, 32], strides = [1, 1]} : vector<8x128xf32> to vector<8x32xf32>
    %34 = vector.extract_strided_slice %29 {offsets = [0, 96], sizes = [8, 32], strides = [1, 1]} : vector<8x128xf32> to vector<8x32xf32>
    %35 = arith.mulf %32, %19 : vector<8x32xf32>
    %36 = arith.mulf %31, %33 : vector<8x32xf32>
    %37 = arith.addf %35, %36 : vector<8x32xf32>
    %38 = math.tanh %37 : vector<8x32xf32>
    %39 = arith.mulf %34, %38 : vector<8x32xf32>
    %40 = tpu.concatenate %39, %18 in 1 : vector<8x32xf32>, vector<8x32xf32> -> vector<8x64xf32>
    %41 = arith.truncf %40 : vector<8x64xf32> to vector<8x64xbf16>
    %cst_17 = arith.constant dense<0.000000e+00> : vector<8x128xf32>
    %42 = tpu.matmul %41, %11, %cst_17 {dimension_numbers = #tpu.dot_dimension_numbers<[1], [0], [0], [1], [0, 0, 1, 1], [], []>} : vector<8x64xbf16>, vector<64x128xbf16>, vector<8x128xf32> -> vector<8x128xf32>
    %43 = vector.broadcast %13 : vector<1x128xf32> to vector<8x128xf32>
    %44 = arith.addf %42, %43 : vector<8x128xf32>
    %45 = arith.negf %44 : vector<8x128xf32>
    %46 = math.exp %45 : vector<8x128xf32>
    %cst_18 = arith.constant 1.000000e+00 : f32
    %47 = vector.broadcast %cst_18 : f32 to vector<8x128xf32>
    %48 = arith.addf %47, %46 : vector<8x128xf32>
    %49 = arith.divf %47, %48 : vector<8x128xf32>
    %50 = math.tanh %44 : vector<8x128xf32>
    %51 = vector.extract_strided_slice %49 {offsets = [0, 0], sizes = [8, 32], strides = [1, 1]} : vector<8x128xf32> to vector<8x32xf32>
    %52 = vector.extract_strided_slice %49 {offsets = [0, 32], sizes = [8, 32], strides = [1, 1]} : vector<8x128xf32> to vector<8x32xf32>
    %53 = vector.extract_strided_slice %50 {offsets = [0, 64], sizes = [8, 32], strides = [1, 1]} : vector<8x128xf32> to vector<8x32xf32>
    %54 = vector.extract_strided_slice %49 {offsets = [0, 96], sizes = [8, 32], strides = [1, 1]} : vector<8x128xf32> to vector<8x32xf32>
    %55 = arith.mulf %52, %20 : vector<8x32xf32>
    %56 = arith.mulf %51, %53 : vector<8x32xf32>
    %57 = arith.addf %55, %56 : vector<8x32xf32>
    %58 = math.tanh %57 : vector<8x32xf32>
    %59 = arith.mulf %54, %58 : vector<8x32xf32>
    %60 = vector.extract_strided_slice %16 {offsets = [8, 0], sizes = [8, 128], strides = [1, 1]} : vector<64x128xf32> to vector<8x128xf32>
    %61 = arith.truncf %39 : vector<8x32xf32> to vector<8x32xbf16>
    %cst_19 = arith.constant dense<0.000000e+00> : vector<8x128xf32>
    %62 = tpu.matmul %61, %10, %cst_19 {dimension_numbers = #tpu.dot_dimension_numbers<[1], [0], [0], [1], [0, 0, 1, 1], [], []>} : vector<8x32xbf16>, vector<32x128xbf16>, vector<8x128xf32> -> vector<8x128xf32>
    %63 = arith.addf %60, %62 : vector<8x128xf32>
    %64 = arith.negf %63 : vector<8x128xf32>
    %65 = math.exp %64 : vector<8x128xf32>
    %cst_20 = arith.constant 1.000000e+00 : f32
    %66 = vector.broadcast %cst_20 : f32 to vector<8x128xf32>
    %67 = arith.addf %66, %65 : vector<8x128xf32>
    %68 = arith.divf %66, %67 : vector<8x128xf32>
    %69 = math.tanh %63 : vector<8x128xf32>
    %70 = vector.extract_strided_slice %68 {offsets = [0, 0], sizes = [8, 32], strides = [1, 1]} : vector<8x128xf32> to vector<8x32xf32>
    %71 = vector.extract_strided_slice %68 {offsets = [0, 32], sizes = [8, 32], strides = [1, 1]} : vector<8x128xf32> to vector<8x32xf32>
    %72 = vector.extract_strided_slice %69 {offsets = [0, 64], sizes = [8, 32], strides = [1, 1]} : vector<8x128xf32> to vector<8x32xf32>
    %73 = vector.extract_strided_slice %68 {offsets = [0, 96], sizes = [8, 32], strides = [1, 1]} : vector<8x128xf32> to vector<8x32xf32>
    %74 = arith.mulf %71, %37 : vector<8x32xf32>
    %75 = arith.mulf %70, %72 : vector<8x32xf32>
    %76 = arith.addf %74, %75 : vector<8x32xf32>
    %77 = math.tanh %76 : vector<8x32xf32>
    %78 = arith.mulf %73, %77 : vector<8x32xf32>
    %79 = tpu.concatenate %78, %59 in 1 : vector<8x32xf32>, vector<8x32xf32> -> vector<8x64xf32>
    %80 = arith.truncf %79 : vector<8x64xf32> to vector<8x64xbf16>
    %cst_21 = arith.constant dense<0.000000e+00> : vector<8x128xf32>
    %81 = tpu.matmul %80, %11, %cst_21 {dimension_numbers = #tpu.dot_dimension_numbers<[1], [0], [0], [1], [0, 0, 1, 1], [], []>} : vector<8x64xbf16>, vector<64x128xbf16>, vector<8x128xf32> -> vector<8x128xf32>
    %82 = vector.broadcast %13 : vector<1x128xf32> to vector<8x128xf32>
    %83 = arith.addf %81, %82 : vector<8x128xf32>
    %84 = arith.negf %83 : vector<8x128xf32>
    %85 = math.exp %84 : vector<8x128xf32>
    %cst_22 = arith.constant 1.000000e+00 : f32
    %86 = vector.broadcast %cst_22 : f32 to vector<8x128xf32>
    %87 = arith.addf %86, %85 : vector<8x128xf32>
    %88 = arith.divf %86, %87 : vector<8x128xf32>
    %89 = math.tanh %83 : vector<8x128xf32>
    %90 = vector.extract_strided_slice %88 {offsets = [0, 0], sizes = [8, 32], strides = [1, 1]} : vector<8x128xf32> to vector<8x32xf32>
    %91 = vector.extract_strided_slice %88 {offsets = [0, 32], sizes = [8, 32], strides = [1, 1]} : vector<8x128xf32> to vector<8x32xf32>
    %92 = vector.extract_strided_slice %89 {offsets = [0, 64], sizes = [8, 32], strides = [1, 1]} : vector<8x128xf32> to vector<8x32xf32>
    %93 = vector.extract_strided_slice %88 {offsets = [0, 96], sizes = [8, 32], strides = [1, 1]} : vector<8x128xf32> to vector<8x32xf32>
    %94 = arith.mulf %91, %57 : vector<8x32xf32>
    %95 = arith.mulf %90, %92 : vector<8x32xf32>
    %96 = arith.addf %94, %95 : vector<8x32xf32>
    %97 = math.tanh %96 : vector<8x32xf32>
    %98 = arith.mulf %93, %97 : vector<8x32xf32>
    %99 = vector.extract_strided_slice %16 {offsets = [16, 0], sizes = [8, 128], strides = [1, 1]} : vector<64x128xf32> to vector<8x128xf32>
    %100 = arith.truncf %78 : vector<8x32xf32> to vector<8x32xbf16>
    %cst_23 = arith.constant dense<0.000000e+00> : vector<8x128xf32>
    %101 = tpu.matmul %100, %10, %cst_23 {dimension_numbers = #tpu.dot_dimension_numbers<[1], [0], [0], [1], [0, 0, 1, 1], [], []>} : vector<8x32xbf16>, vector<32x128xbf16>, vector<8x128xf32> -> vector<8x128xf32>
    %102 = arith.addf %99, %101 : vector<8x128xf32>
    %103 = arith.negf %102 : vector<8x128xf32>
    %104 = math.exp %103 : vector<8x128xf32>
    %cst_24 = arith.constant 1.000000e+00 : f32
    %105 = vector.broadcast %cst_24 : f32 to vector<8x128xf32>
    %106 = arith.addf %105, %104 : vector<8x128xf32>
    %107 = arith.divf %105, %106 : vector<8x128xf32>
    %108 = math.tanh %102 : vector<8x128xf32>
    %109 = vector.extract_strided_slice %107 {offsets = [0, 0], sizes = [8, 32], strides = [1, 1]} : vector<8x128xf32> to vector<8x32xf32>
    %110 = vector.extract_strided_slice %107 {offsets = [0, 32], sizes = [8, 32], strides = [1, 1]} : vector<8x128xf32> to vector<8x32xf32>
    %111 = vector.extract_strided_slice %108 {offsets = [0, 64], sizes = [8, 32], strides = [1, 1]} : vector<8x128xf32> to vector<8x32xf32>
    %112 = vector.extract_strided_slice %107 {offsets = [0, 96], sizes = [8, 32], strides = [1, 1]} : vector<8x128xf32> to vector<8x32xf32>
    %113 = arith.mulf %110, %76 : vector<8x32xf32>
    %114 = arith.mulf %109, %111 : vector<8x32xf32>
    %115 = arith.addf %113, %114 : vector<8x32xf32>
    %116 = math.tanh %115 : vector<8x32xf32>
    %117 = arith.mulf %112, %116 : vector<8x32xf32>
    %118 = tpu.concatenate %117, %98 in 1 : vector<8x32xf32>, vector<8x32xf32> -> vector<8x64xf32>
    %119 = arith.truncf %118 : vector<8x64xf32> to vector<8x64xbf16>
    %cst_25 = arith.constant dense<0.000000e+00> : vector<8x128xf32>
    %120 = tpu.matmul %119, %11, %cst_25 {dimension_numbers = #tpu.dot_dimension_numbers<[1], [0], [0], [1], [0, 0, 1, 1], [], []>} : vector<8x64xbf16>, vector<64x128xbf16>, vector<8x128xf32> -> vector<8x128xf32>
    %121 = vector.broadcast %13 : vector<1x128xf32> to vector<8x128xf32>
    %122 = arith.addf %120, %121 : vector<8x128xf32>
    %123 = arith.negf %122 : vector<8x128xf32>
    %124 = math.exp %123 : vector<8x128xf32>
    %cst_26 = arith.constant 1.000000e+00 : f32
    %125 = vector.broadcast %cst_26 : f32 to vector<8x128xf32>
    %126 = arith.addf %125, %124 : vector<8x128xf32>
    %127 = arith.divf %125, %126 : vector<8x128xf32>
    %128 = math.tanh %122 : vector<8x128xf32>
    %129 = vector.extract_strided_slice %127 {offsets = [0, 0], sizes = [8, 32], strides = [1, 1]} : vector<8x128xf32> to vector<8x32xf32>
    %130 = vector.extract_strided_slice %127 {offsets = [0, 32], sizes = [8, 32], strides = [1, 1]} : vector<8x128xf32> to vector<8x32xf32>
    %131 = vector.extract_strided_slice %128 {offsets = [0, 64], sizes = [8, 32], strides = [1, 1]} : vector<8x128xf32> to vector<8x32xf32>
    %132 = vector.extract_strided_slice %127 {offsets = [0, 96], sizes = [8, 32], strides = [1, 1]} : vector<8x128xf32> to vector<8x32xf32>
    %133 = arith.mulf %130, %96 : vector<8x32xf32>
    %134 = arith.mulf %129, %131 : vector<8x32xf32>
    %135 = arith.addf %133, %134 : vector<8x32xf32>
    %136 = math.tanh %135 : vector<8x32xf32>
    %137 = arith.mulf %132, %136 : vector<8x32xf32>
    %138 = vector.extract_strided_slice %16 {offsets = [24, 0], sizes = [8, 128], strides = [1, 1]} : vector<64x128xf32> to vector<8x128xf32>
    %139 = arith.truncf %117 : vector<8x32xf32> to vector<8x32xbf16>
    %cst_27 = arith.constant dense<0.000000e+00> : vector<8x128xf32>
    %140 = tpu.matmul %139, %10, %cst_27 {dimension_numbers = #tpu.dot_dimension_numbers<[1], [0], [0], [1], [0, 0, 1, 1], [], []>} : vector<8x32xbf16>, vector<32x128xbf16>, vector<8x128xf32> -> vector<8x128xf32>
    %141 = arith.addf %138, %140 : vector<8x128xf32>
    %142 = arith.negf %141 : vector<8x128xf32>
    %143 = math.exp %142 : vector<8x128xf32>
    %cst_28 = arith.constant 1.000000e+00 : f32
    %144 = vector.broadcast %cst_28 : f32 to vector<8x128xf32>
    %145 = arith.addf %144, %143 : vector<8x128xf32>
    %146 = arith.divf %144, %145 : vector<8x128xf32>
    %147 = math.tanh %141 : vector<8x128xf32>
    %148 = vector.extract_strided_slice %146 {offsets = [0, 0], sizes = [8, 32], strides = [1, 1]} : vector<8x128xf32> to vector<8x32xf32>
    %149 = vector.extract_strided_slice %146 {offsets = [0, 32], sizes = [8, 32], strides = [1, 1]} : vector<8x128xf32> to vector<8x32xf32>
    %150 = vector.extract_strided_slice %147 {offsets = [0, 64], sizes = [8, 32], strides = [1, 1]} : vector<8x128xf32> to vector<8x32xf32>
    %151 = vector.extract_strided_slice %146 {offsets = [0, 96], sizes = [8, 32], strides = [1, 1]} : vector<8x128xf32> to vector<8x32xf32>
    %152 = arith.mulf %149, %115 : vector<8x32xf32>
    %153 = arith.mulf %148, %150 : vector<8x32xf32>
    %154 = arith.addf %152, %153 : vector<8x32xf32>
    %155 = math.tanh %154 : vector<8x32xf32>
    %156 = arith.mulf %151, %155 : vector<8x32xf32>
    %157 = tpu.concatenate %156, %137 in 1 : vector<8x32xf32>, vector<8x32xf32> -> vector<8x64xf32>
    %158 = arith.truncf %157 : vector<8x64xf32> to vector<8x64xbf16>
    %cst_29 = arith.constant dense<0.000000e+00> : vector<8x128xf32>
    %159 = tpu.matmul %158, %11, %cst_29 {dimension_numbers = #tpu.dot_dimension_numbers<[1], [0], [0], [1], [0, 0, 1, 1], [], []>} : vector<8x64xbf16>, vector<64x128xbf16>, vector<8x128xf32> -> vector<8x128xf32>
    %160 = vector.broadcast %13 : vector<1x128xf32> to vector<8x128xf32>
    %161 = arith.addf %159, %160 : vector<8x128xf32>
    %162 = arith.negf %161 : vector<8x128xf32>
    %163 = math.exp %162 : vector<8x128xf32>
    %cst_30 = arith.constant 1.000000e+00 : f32
    %164 = vector.broadcast %cst_30 : f32 to vector<8x128xf32>
    %165 = arith.addf %164, %163 : vector<8x128xf32>
    %166 = arith.divf %164, %165 : vector<8x128xf32>
    %167 = math.tanh %161 : vector<8x128xf32>
    %168 = vector.extract_strided_slice %166 {offsets = [0, 0], sizes = [8, 32], strides = [1, 1]} : vector<8x128xf32> to vector<8x32xf32>
    %169 = vector.extract_strided_slice %166 {offsets = [0, 32], sizes = [8, 32], strides = [1, 1]} : vector<8x128xf32> to vector<8x32xf32>
    %170 = vector.extract_strided_slice %167 {offsets = [0, 64], sizes = [8, 32], strides = [1, 1]} : vector<8x128xf32> to vector<8x32xf32>
    %171 = vector.extract_strided_slice %166 {offsets = [0, 96], sizes = [8, 32], strides = [1, 1]} : vector<8x128xf32> to vector<8x32xf32>
    %172 = arith.mulf %169, %135 : vector<8x32xf32>
    %173 = arith.mulf %168, %170 : vector<8x32xf32>
    %174 = arith.addf %172, %173 : vector<8x32xf32>
    %175 = math.tanh %174 : vector<8x32xf32>
    %176 = arith.mulf %171, %175 : vector<8x32xf32>
    %177 = vector.extract_strided_slice %16 {offsets = [32, 0], sizes = [8, 128], strides = [1, 1]} : vector<64x128xf32> to vector<8x128xf32>
    %178 = arith.truncf %156 : vector<8x32xf32> to vector<8x32xbf16>
    %cst_31 = arith.constant dense<0.000000e+00> : vector<8x128xf32>
    %179 = tpu.matmul %178, %10, %cst_31 {dimension_numbers = #tpu.dot_dimension_numbers<[1], [0], [0], [1], [0, 0, 1, 1], [], []>} : vector<8x32xbf16>, vector<32x128xbf16>, vector<8x128xf32> -> vector<8x128xf32>
    %180 = arith.addf %177, %179 : vector<8x128xf32>
    %181 = arith.negf %180 : vector<8x128xf32>
    %182 = math.exp %181 : vector<8x128xf32>
    %cst_32 = arith.constant 1.000000e+00 : f32
    %183 = vector.broadcast %cst_32 : f32 to vector<8x128xf32>
    %184 = arith.addf %183, %182 : vector<8x128xf32>
    %185 = arith.divf %183, %184 : vector<8x128xf32>
    %186 = math.tanh %180 : vector<8x128xf32>
    %187 = vector.extract_strided_slice %185 {offsets = [0, 0], sizes = [8, 32], strides = [1, 1]} : vector<8x128xf32> to vector<8x32xf32>
    %188 = vector.extract_strided_slice %185 {offsets = [0, 32], sizes = [8, 32], strides = [1, 1]} : vector<8x128xf32> to vector<8x32xf32>
    %189 = vector.extract_strided_slice %186 {offsets = [0, 64], sizes = [8, 32], strides = [1, 1]} : vector<8x128xf32> to vector<8x32xf32>
    %190 = vector.extract_strided_slice %185 {offsets = [0, 96], sizes = [8, 32], strides = [1, 1]} : vector<8x128xf32> to vector<8x32xf32>
    %191 = arith.mulf %188, %154 : vector<8x32xf32>
    %192 = arith.mulf %187, %189 : vector<8x32xf32>
    %193 = arith.addf %191, %192 : vector<8x32xf32>
    %194 = math.tanh %193 : vector<8x32xf32>
    %195 = arith.mulf %190, %194 : vector<8x32xf32>
    %196 = tpu.concatenate %195, %176 in 1 : vector<8x32xf32>, vector<8x32xf32> -> vector<8x64xf32>
    %197 = arith.truncf %196 : vector<8x64xf32> to vector<8x64xbf16>
    %cst_33 = arith.constant dense<0.000000e+00> : vector<8x128xf32>
    %198 = tpu.matmul %197, %11, %cst_33 {dimension_numbers = #tpu.dot_dimension_numbers<[1], [0], [0], [1], [0, 0, 1, 1], [], []>} : vector<8x64xbf16>, vector<64x128xbf16>, vector<8x128xf32> -> vector<8x128xf32>
    %199 = vector.broadcast %13 : vector<1x128xf32> to vector<8x128xf32>
    %200 = arith.addf %198, %199 : vector<8x128xf32>
    %201 = arith.negf %200 : vector<8x128xf32>
    %202 = math.exp %201 : vector<8x128xf32>
    %cst_34 = arith.constant 1.000000e+00 : f32
    %203 = vector.broadcast %cst_34 : f32 to vector<8x128xf32>
    %204 = arith.addf %203, %202 : vector<8x128xf32>
    %205 = arith.divf %203, %204 : vector<8x128xf32>
    %206 = math.tanh %200 : vector<8x128xf32>
    %207 = vector.extract_strided_slice %205 {offsets = [0, 0], sizes = [8, 32], strides = [1, 1]} : vector<8x128xf32> to vector<8x32xf32>
    %208 = vector.extract_strided_slice %205 {offsets = [0, 32], sizes = [8, 32], strides = [1, 1]} : vector<8x128xf32> to vector<8x32xf32>
    %209 = vector.extract_strided_slice %206 {offsets = [0, 64], sizes = [8, 32], strides = [1, 1]} : vector<8x128xf32> to vector<8x32xf32>
    %210 = vector.extract_strided_slice %205 {offsets = [0, 96], sizes = [8, 32], strides = [1, 1]} : vector<8x128xf32> to vector<8x32xf32>
    %211 = arith.mulf %208, %174 : vector<8x32xf32>
    %212 = arith.mulf %207, %209 : vector<8x32xf32>
    %213 = arith.addf %211, %212 : vector<8x32xf32>
    %214 = math.tanh %213 : vector<8x32xf32>
    %215 = arith.mulf %210, %214 : vector<8x32xf32>
    %216 = vector.extract_strided_slice %16 {offsets = [40, 0], sizes = [8, 128], strides = [1, 1]} : vector<64x128xf32> to vector<8x128xf32>
    %217 = arith.truncf %195 : vector<8x32xf32> to vector<8x32xbf16>
    %cst_35 = arith.constant dense<0.000000e+00> : vector<8x128xf32>
    %218 = tpu.matmul %217, %10, %cst_35 {dimension_numbers = #tpu.dot_dimension_numbers<[1], [0], [0], [1], [0, 0, 1, 1], [], []>} : vector<8x32xbf16>, vector<32x128xbf16>, vector<8x128xf32> -> vector<8x128xf32>
    %219 = arith.addf %216, %218 : vector<8x128xf32>
    %220 = arith.negf %219 : vector<8x128xf32>
    %221 = math.exp %220 : vector<8x128xf32>
    %cst_36 = arith.constant 1.000000e+00 : f32
    %222 = vector.broadcast %cst_36 : f32 to vector<8x128xf32>
    %223 = arith.addf %222, %221 : vector<8x128xf32>
    %224 = arith.divf %222, %223 : vector<8x128xf32>
    %225 = math.tanh %219 : vector<8x128xf32>
    %226 = vector.extract_strided_slice %224 {offsets = [0, 0], sizes = [8, 32], strides = [1, 1]} : vector<8x128xf32> to vector<8x32xf32>
    %227 = vector.extract_strided_slice %224 {offsets = [0, 32], sizes = [8, 32], strides = [1, 1]} : vector<8x128xf32> to vector<8x32xf32>
    %228 = vector.extract_strided_slice %225 {offsets = [0, 64], sizes = [8, 32], strides = [1, 1]} : vector<8x128xf32> to vector<8x32xf32>
    %229 = vector.extract_strided_slice %224 {offsets = [0, 96], sizes = [8, 32], strides = [1, 1]} : vector<8x128xf32> to vector<8x32xf32>
    %230 = arith.mulf %227, %193 : vector<8x32xf32>
    %231 = arith.mulf %226, %228 : vector<8x32xf32>
    %232 = arith.addf %230, %231 : vector<8x32xf32>
    %233 = math.tanh %232 : vector<8x32xf32>
    %234 = arith.mulf %229, %233 : vector<8x32xf32>
    %235 = tpu.concatenate %234, %215 in 1 : vector<8x32xf32>, vector<8x32xf32> -> vector<8x64xf32>
    %236 = arith.truncf %235 : vector<8x64xf32> to vector<8x64xbf16>
    %cst_37 = arith.constant dense<0.000000e+00> : vector<8x128xf32>
    %237 = tpu.matmul %236, %11, %cst_37 {dimension_numbers = #tpu.dot_dimension_numbers<[1], [0], [0], [1], [0, 0, 1, 1], [], []>} : vector<8x64xbf16>, vector<64x128xbf16>, vector<8x128xf32> -> vector<8x128xf32>
    %238 = vector.broadcast %13 : vector<1x128xf32> to vector<8x128xf32>
    %239 = arith.addf %237, %238 : vector<8x128xf32>
    %240 = arith.negf %239 : vector<8x128xf32>
    %241 = math.exp %240 : vector<8x128xf32>
    %cst_38 = arith.constant 1.000000e+00 : f32
    %242 = vector.broadcast %cst_38 : f32 to vector<8x128xf32>
    %243 = arith.addf %242, %241 : vector<8x128xf32>
    %244 = arith.divf %242, %243 : vector<8x128xf32>
    %245 = math.tanh %239 : vector<8x128xf32>
    %246 = vector.extract_strided_slice %244 {offsets = [0, 0], sizes = [8, 32], strides = [1, 1]} : vector<8x128xf32> to vector<8x32xf32>
    %247 = vector.extract_strided_slice %244 {offsets = [0, 32], sizes = [8, 32], strides = [1, 1]} : vector<8x128xf32> to vector<8x32xf32>
    %248 = vector.extract_strided_slice %245 {offsets = [0, 64], sizes = [8, 32], strides = [1, 1]} : vector<8x128xf32> to vector<8x32xf32>
    %249 = vector.extract_strided_slice %244 {offsets = [0, 96], sizes = [8, 32], strides = [1, 1]} : vector<8x128xf32> to vector<8x32xf32>
    %250 = arith.mulf %247, %213 : vector<8x32xf32>
    %251 = arith.mulf %246, %248 : vector<8x32xf32>
    %252 = arith.addf %250, %251 : vector<8x32xf32>
    %253 = math.tanh %252 : vector<8x32xf32>
    %254 = arith.mulf %249, %253 : vector<8x32xf32>
    %255 = vector.extract_strided_slice %16 {offsets = [48, 0], sizes = [8, 128], strides = [1, 1]} : vector<64x128xf32> to vector<8x128xf32>
    %256 = arith.truncf %234 : vector<8x32xf32> to vector<8x32xbf16>
    %cst_39 = arith.constant dense<0.000000e+00> : vector<8x128xf32>
    %257 = tpu.matmul %256, %10, %cst_39 {dimension_numbers = #tpu.dot_dimension_numbers<[1], [0], [0], [1], [0, 0, 1, 1], [], []>} : vector<8x32xbf16>, vector<32x128xbf16>, vector<8x128xf32> -> vector<8x128xf32>
    %258 = arith.addf %255, %257 : vector<8x128xf32>
    %259 = arith.negf %258 : vector<8x128xf32>
    %260 = math.exp %259 : vector<8x128xf32>
    %cst_40 = arith.constant 1.000000e+00 : f32
    %261 = vector.broadcast %cst_40 : f32 to vector<8x128xf32>
    %262 = arith.addf %261, %260 : vector<8x128xf32>
    %263 = arith.divf %261, %262 : vector<8x128xf32>
    %264 = math.tanh %258 : vector<8x128xf32>
    %265 = vector.extract_strided_slice %263 {offsets = [0, 0], sizes = [8, 32], strides = [1, 1]} : vector<8x128xf32> to vector<8x32xf32>
    %266 = vector.extract_strided_slice %263 {offsets = [0, 32], sizes = [8, 32], strides = [1, 1]} : vector<8x128xf32> to vector<8x32xf32>
    %267 = vector.extract_strided_slice %264 {offsets = [0, 64], sizes = [8, 32], strides = [1, 1]} : vector<8x128xf32> to vector<8x32xf32>
    %268 = vector.extract_strided_slice %263 {offsets = [0, 96], sizes = [8, 32], strides = [1, 1]} : vector<8x128xf32> to vector<8x32xf32>
    %269 = arith.mulf %266, %232 : vector<8x32xf32>
    %270 = arith.mulf %265, %267 : vector<8x32xf32>
    %271 = arith.addf %269, %270 : vector<8x32xf32>
    %272 = math.tanh %271 : vector<8x32xf32>
    %273 = arith.mulf %268, %272 : vector<8x32xf32>
    %274 = tpu.concatenate %273, %254 in 1 : vector<8x32xf32>, vector<8x32xf32> -> vector<8x64xf32>
    %275 = arith.truncf %274 : vector<8x64xf32> to vector<8x64xbf16>
    %cst_41 = arith.constant dense<0.000000e+00> : vector<8x128xf32>
    %276 = tpu.matmul %275, %11, %cst_41 {dimension_numbers = #tpu.dot_dimension_numbers<[1], [0], [0], [1], [0, 0, 1, 1], [], []>} : vector<8x64xbf16>, vector<64x128xbf16>, vector<8x128xf32> -> vector<8x128xf32>
    %277 = vector.broadcast %13 : vector<1x128xf32> to vector<8x128xf32>
    %278 = arith.addf %276, %277 : vector<8x128xf32>
    %279 = arith.negf %278 : vector<8x128xf32>
    %280 = math.exp %279 : vector<8x128xf32>
    %cst_42 = arith.constant 1.000000e+00 : f32
    %281 = vector.broadcast %cst_42 : f32 to vector<8x128xf32>
    %282 = arith.addf %281, %280 : vector<8x128xf32>
    %283 = arith.divf %281, %282 : vector<8x128xf32>
    %284 = math.tanh %278 : vector<8x128xf32>
    %285 = vector.extract_strided_slice %283 {offsets = [0, 0], sizes = [8, 32], strides = [1, 1]} : vector<8x128xf32> to vector<8x32xf32>
    %286 = vector.extract_strided_slice %283 {offsets = [0, 32], sizes = [8, 32], strides = [1, 1]} : vector<8x128xf32> to vector<8x32xf32>
    %287 = vector.extract_strided_slice %284 {offsets = [0, 64], sizes = [8, 32], strides = [1, 1]} : vector<8x128xf32> to vector<8x32xf32>
    %288 = vector.extract_strided_slice %283 {offsets = [0, 96], sizes = [8, 32], strides = [1, 1]} : vector<8x128xf32> to vector<8x32xf32>
    %289 = arith.mulf %286, %252 : vector<8x32xf32>
    %290 = arith.mulf %285, %287 : vector<8x32xf32>
    %291 = arith.addf %289, %290 : vector<8x32xf32>
    %292 = math.tanh %291 : vector<8x32xf32>
    %293 = arith.mulf %288, %292 : vector<8x32xf32>
    %294 = vector.extract_strided_slice %16 {offsets = [56, 0], sizes = [8, 128], strides = [1, 1]} : vector<64x128xf32> to vector<8x128xf32>
    %295 = arith.truncf %273 : vector<8x32xf32> to vector<8x32xbf16>
    %cst_43 = arith.constant dense<0.000000e+00> : vector<8x128xf32>
    %296 = tpu.matmul %295, %10, %cst_43 {dimension_numbers = #tpu.dot_dimension_numbers<[1], [0], [0], [1], [0, 0, 1, 1], [], []>} : vector<8x32xbf16>, vector<32x128xbf16>, vector<8x128xf32> -> vector<8x128xf32>
    %297 = arith.addf %294, %296 : vector<8x128xf32>
    %298 = arith.negf %297 : vector<8x128xf32>
    %299 = math.exp %298 : vector<8x128xf32>
    %cst_44 = arith.constant 1.000000e+00 : f32
    %300 = vector.broadcast %cst_44 : f32 to vector<8x128xf32>
    %301 = arith.addf %300, %299 : vector<8x128xf32>
    %302 = arith.divf %300, %301 : vector<8x128xf32>
    %303 = math.tanh %297 : vector<8x128xf32>
    %304 = vector.extract_strided_slice %302 {offsets = [0, 0], sizes = [8, 32], strides = [1, 1]} : vector<8x128xf32> to vector<8x32xf32>
    %305 = vector.extract_strided_slice %302 {offsets = [0, 32], sizes = [8, 32], strides = [1, 1]} : vector<8x128xf32> to vector<8x32xf32>
    %306 = vector.extract_strided_slice %303 {offsets = [0, 64], sizes = [8, 32], strides = [1, 1]} : vector<8x128xf32> to vector<8x32xf32>
    %307 = vector.extract_strided_slice %302 {offsets = [0, 96], sizes = [8, 32], strides = [1, 1]} : vector<8x128xf32> to vector<8x32xf32>
    %308 = arith.mulf %305, %271 : vector<8x32xf32>
    %309 = arith.mulf %304, %306 : vector<8x32xf32>
    %310 = arith.addf %308, %309 : vector<8x32xf32>
    %311 = math.tanh %310 : vector<8x32xf32>
    %312 = arith.mulf %307, %311 : vector<8x32xf32>
    %313 = tpu.concatenate %312, %293 in 1 : vector<8x32xf32>, vector<8x32xf32> -> vector<8x64xf32>
    %314 = arith.truncf %313 : vector<8x64xf32> to vector<8x64xbf16>
    %cst_45 = arith.constant dense<0.000000e+00> : vector<8x128xf32>
    %315 = tpu.matmul %314, %11, %cst_45 {dimension_numbers = #tpu.dot_dimension_numbers<[1], [0], [0], [1], [0, 0, 1, 1], [], []>} : vector<8x64xbf16>, vector<64x128xbf16>, vector<8x128xf32> -> vector<8x128xf32>
    %316 = vector.broadcast %13 : vector<1x128xf32> to vector<8x128xf32>
    %317 = arith.addf %315, %316 : vector<8x128xf32>
    %318 = arith.negf %317 : vector<8x128xf32>
    %319 = math.exp %318 : vector<8x128xf32>
    %cst_46 = arith.constant 1.000000e+00 : f32
    %320 = vector.broadcast %cst_46 : f32 to vector<8x128xf32>
    %321 = arith.addf %320, %319 : vector<8x128xf32>
    %322 = arith.divf %320, %321 : vector<8x128xf32>
    %323 = math.tanh %317 : vector<8x128xf32>
    %324 = vector.extract_strided_slice %322 {offsets = [0, 0], sizes = [8, 32], strides = [1, 1]} : vector<8x128xf32> to vector<8x32xf32>
    %325 = vector.extract_strided_slice %322 {offsets = [0, 32], sizes = [8, 32], strides = [1, 1]} : vector<8x128xf32> to vector<8x32xf32>
    %326 = vector.extract_strided_slice %323 {offsets = [0, 64], sizes = [8, 32], strides = [1, 1]} : vector<8x128xf32> to vector<8x32xf32>
    %327 = vector.extract_strided_slice %322 {offsets = [0, 96], sizes = [8, 32], strides = [1, 1]} : vector<8x128xf32> to vector<8x32xf32>
    %328 = arith.mulf %325, %291 : vector<8x32xf32>
    %329 = arith.mulf %324, %326 : vector<8x32xf32>
    %330 = arith.addf %328, %329 : vector<8x32xf32>
    %331 = math.tanh %330 : vector<8x32xf32>
    %332 = arith.mulf %327, %331 : vector<8x32xf32>
    %c72 = arith.constant 72 : index
    %c0_47 = arith.constant 0 : index
    %333 = vector.load %arg1[%c72, %c0_47] : memref<112x128xf32, #tpu.memory_space<vmem>>, vector<32x128xf32>
    %c104 = arith.constant 104 : index
    %c0_48 = arith.constant 0 : index
    %334 = vector.load %arg1[%c104, %c0_48] : memref<112x128xf32, #tpu.memory_space<vmem>>, vector<1x128xf32>
    %cst_49 = arith.constant dense<0.000000e+00> : vector<8x128xf32>
    %335 = tpu.matmul %332, %333, %cst_49 {dimension_numbers = #tpu.dot_dimension_numbers<[1], [0], [0], [1], [0, 0, 1, 1], [], []>} : vector<8x32xf32>, vector<32x128xf32>, vector<8x128xf32> -> vector<8x128xf32>
    %336 = vector.broadcast %334 : vector<1x128xf32> to vector<8x128xf32>
    %337 = arith.addf %335, %336 : vector<8x128xf32>
    %c0_50 = arith.constant 0 : index
    %c0_51 = arith.constant 0 : index
    %338 = vector.load %arg3[%c0_50, %c0_51] : memref<8x128xf32, #tpu.memory_space<vmem>>, vector<8x128xf32>
    tpu.vector_store %arg3[%c0_50, %c0_51], %337 {strides = array<i32>} : memref<8x128xf32, #tpu.memory_space<vmem>>, vector<8x128xf32>,
    return
  }
}

</mosaic_0001>

<bundles_post_ra>
// kernel: _lambda_.1
= control target key start
LH: loop header
LB: loop body
LE: loop exit
PB: predicated region body
PF: predicated region fallthrough
CT: control target
= control target key end

     0   :  { %8 = vsyncpa [#allocation3], 0  ;;  %s2213_s12 = smov [#allocation2]   ;;  %s2648_s0 = inlined_call_operand.vmem [shape: s32[64,1], index: 0, kind: input, shape index: {}]   ;;  %s2649_s1 = inlined_call_operand.hbm [shape: f32[112,128], index: 1, kind: input, shape index: {}]   ;;  %s2650_s2 = inlined_call_operand.vmem [shape: bf16[128,128], index: 2, kind: input, shape index: {}]   ;;  %s2651_s3 = inlined_call_operand.vmem [shape: f32[8,128], index: 3, kind: output, shape index: {}]  }
   0x1   :  { %s16_s13 = sshll.u32 %s2213_s12, 4  ;;  %s2189_s16 = scalar_lea.hbm %s2649_s1, 1792  ;;  %s17_s13 = int_to_ptr.vmem [resolvable:$true] %s16_s13 }
   0x2   :  { %p2190_p0 = scmp.ne.s32.totalorder %s2649_s1, %s2189_s16  ;;  %p2193_p1 = scmp.lt.u32.totalorder %s2189_s16, %s2649_s1 }
   0x4   :  { %p2195_p2 = pnand %p2193_p1, %p2190_p0 }
   0x6   :  { %2198 = shalt.err (!%p2195_p2)
}
   0x7   :  { %s2199_s21 = scalar_lea.vmem %s17_s13, 1792  ;;  %p2204_p4 = scmp.lt.s32.totalorder %s17_s13, %s17_s13 }
   0x8   :  { %p2200_p3 = scmp.ne.s32.totalorder %s17_s13, %s2199_s21  ;;  %p2205_p5 = scmp.lt.s32.totalorder %s2199_s21, %s2199_s21 }
   0xa   :  { %p2206_p6 = por %p2205_p5, %p2204_p4 }
   0xc   :  { %p2207_p7 = pnand %p2206_p6, %p2200_p3 }
   0xe   :  { %2210 = shalt.err (!%p2207_p7)
}
   0xf   :  { %s2214_s22 = smov 128   ;;  %s2215_s23 = smov 8  }
  0x10   :  { %22 = dma.hbm_to_vmem [thread:$0]  %s2649_s1, 1792, %s17_s13, [#allocation3], %s2214_s22, %s2214_s22, %s2215_s23  }
  0x11   :  { %2211 = dma.done.wait [#allocation3], 1792  }
  0x12   :  { %2212 = vsyncadd [#allocation3], 4294965504  ;;  %v2216_v0 = vmov 0   ;;  %v31_v1 = vld [vmem:[%s2648_s0 + $0x10] sm:$0xff]  ;;  %v29_v2 = vld [vmem:[%s2648_s0] sm:$0xff]  ;;  %v2217_v22 = vmov 0.0   ;;  %v37_v23 = vlaneseq }
  0x13   :  { %2052 = vset.pattern.permute.xlu1 %v2216_v0  ;;  %2051 = vset.pattern.permute.xlu0 %v2216_v0  ;;  %v32_v3 = vld [vmem:[%s2648_s0 + $0x18] sm:$0xff]  ;;  %v30_v4 = vld [vmem:[%s2648_s0 + $0x8] sm:$0xff]  ;;  %v87_v5 = vld [vmem:[#allocation2] sm:$0xff]  ;;  %vm95_vm0 = vcmask 523264   ;;  %vm2218_vm9 = vmmov 0   ;;  %vm263_vm10 = vcmask 261120  }
  0x14   :  { %46 = vperm.xlu1 %2052, %v31_v1   ;;  %40 = vperm.xlu0 %2051, %v29_v2   ;;  %v88_v6 = vld [vmem:[#allocation2 + $0x8] sm:$0xff]  ;;  %v89_v7 = vld [vmem:[#allocation2 + $0x10] sm:$0xff]  ;;  %v90_v8 = vld [vmem:[#allocation2 + $0x18] sm:$0xff]  ;;  %v38_v24 = vand.u32 127, %v37_v23  ;;  %s2219_s21 = smov 64   ;;  %s2220_s22 = smov 32  }
  0x15   :  { %v34_v9 = vld [vmem:[%s2648_s0 + $0x28] sm:$0xff]  ;;  %v33_v10 = vld [vmem:[%s2648_s0 + $0x20] sm:$0xff]  ;;  %v2020_v11 = vpack.c.bf16 %v88_v6, %v87_v5  ;;  %v2024_v12 = vpack.c.bf16 %v90_v8, %v89_v7  ;;  %v93_v15 = vld [vmem:[#allocation2 + $0x30] sm:$0xff] }
  0x16   :  { %v91_v13 = vld [vmem:[#allocation2 + $0x20] sm:$0xff]  ;;  %v92_v14 = vld [vmem:[#allocation2 + $0x28] sm:$0xff]  ;;  %v94_v16 = vld [vmem:[#allocation2 + $0x38] sm:$0xff] }
  0x17   :  { %2021 = vmatprep.subr.bf16.mxu0 %v2020_v11  ;;  %v36_v17 = vld [vmem:[%s2648_s0 + $0x38] sm:$0xff]  ;;  %v2028_v18 = vpack.c.bf16 %v92_v14, %v91_v13  ;;  %v35_v19 = vld [vmem:[%s2648_s0 + $0x30] sm:$0xff]  ;;  %v2032_v20 = vpack.c.bf16 %v94_v16, %v93_v15  ;;  %v2053_v21 = vld [vmem:[%s2650_s2] sm:$0xff]  }
  0x18   :  { %49 = vperm.xlu1 %2052, %v32_v3   ;;  %43 = vperm.xlu0 %2051, %v30_v4   ;;  %v2054_v41 = vld [vmem:[%s2650_s2 + $0x8] sm:$0xff]   ;;  %v2310_v47 = vld [vmem:[%s2650_s2 + $0x10] sm:$0xff]   ;;  %v2317_v51 = vld [vmem:[%s2650_s2 + $0x18] sm:$0xff]  }
  0x19   :  { %2023 = vmatpush3.bf16.msra.mxu0 %v2020_v11  ;;  %1837 = vmatprep.subr.bf16.mxu1 %v2053_v21  ;;  %v1671_v56 = vld [vmem:[#allocation2 + $0x40] ss:$0 sm:$0xff] }
  0x1a   :  { %2025 = vmatprep.subr.bf16.mxu0 %v2024_v12  ;;  %1838 = vmatpush3.bf16.msra.mxu1 %v2053_v21 }
  0x1b   :  { %1839 = vmatprep.subr.bf16.mxu1 %v2054_v41 }
  0x1c   :  { %55 = vperm.xlu1 %2052, %v34_v9   ;;  %52 = vperm.xlu0 %2051, %v33_v10  }
  0x1d   :  { %2027 = vmatpush3.bf16.msra.mxu0 %v2024_v12 }
  0x1e   :  { %2029 = vmatprep.subr.bf16.mxu0 %v2028_v18  ;;  %1840 = vmatpush3.bf16.msra.mxu1 %v2054_v41 }
  0x1f   :  { %1849 = vmatprep.subr.bf16.mxu1 %v2217_v22 }
  0x20   :  { %61 = vperm.xlu1 %2052, %v36_v17   ;;  %58 = vperm.xlu0 %2051, %v35_v19  }
  0x21   :  { %2031 = vmatpush3.bf16.msra.mxu0 %v2028_v18 }
  0x22   :  { %2033 = vmatprep.subr.bf16.mxu0 %v2032_v20 }
  0x25   :  { %2035 = vmatpush3.bf16.msra.mxu0 %v2032_v20 }
  0x26   :  { %1857 = vmatprep.subr.bf16.mxu0 %v2217_v22 }
  0x93   :  { %v47_v25 = vpop.permute.xlu1 %46  ;;  %v41_v26 = vpop.permute.xlu0 %40 }
  0x94   :  { %vm63_vm1 = vcmp.eq.s32.totalorder %v41_v26, %v38_v24  ;;  %vm65_vm2 = vcmp.eq.s32.totalorder %v47_v25, %v38_v24  ;;  %v2355_v25 = vld [vmem:[%s2650_s2 + $0x20] sm:$0xff]   ;;  %v2361_v26 = vld [vmem:[%s2650_s2 + $0x28] sm:$0xff]  }
  0x95   :  { %v1655_v27 = vsel %vm63_vm1, 1.0, %v2217_v22  ;;  %v1657_v30 = vsel %vm65_vm2, 1.0, %v2217_v22 }
  0x96   :  { %1825 = vmatprep.mubr.msk.f32.mxu0 %vm95_vm0, %v1655_v27  ;;  %v2368_v27 = vld [vmem:[%s2650_s2 + $0x30] sm:$0xff]  }
  0x97   :  { %v50_v28 = vpop.permute.xlu1 %49  ;;  %v44_v29 = vpop.permute.xlu0 %43 }
  0x98   :  { %vm64_vm3 = vcmp.eq.s32.totalorder %v44_v29, %v38_v24  ;;  %vm66_vm4 = vcmp.eq.s32.totalorder %v50_v28, %v38_v24  ;;  %v2376_v29 = vld [vmem:[%s2650_s2 + $0x38] sm:$0xff]  }
  0x99   :  { %v1656_v31 = vsel %vm64_vm3, 1.0, %v2217_v22  ;;  %v1658_v34 = vsel %vm66_vm4, 1.0, %v2217_v22 }
  0x9a   :  { %1826 = vmatmul.mubr.msk.f32.vlgmr.msra.gmra.mrb[0].mxu0 %vm95_vm0, %v1656_v31 }
  0x9b   :  { %v56_v32 = vpop.permute.xlu1 %55  ;;  %1828 = vmatprep.mubr.msk.f32.mxu0 %vm95_vm0, %v1657_v30  ;;  %v53_v33 = vpop.permute.xlu0 %52  ;;  %1858 = vmatpush3.bf16.msra.mxu0 %v2355_v25 }
  0x9c   :  { %vm67_vm5 = vcmp.eq.s32.totalorder %v53_v33, %v38_v24  ;;  %vm68_vm6 = vcmp.eq.s32.totalorder %v56_v32, %v38_v24  ;;  %1859 = vmatprep.subr.bf16.mxu0 %v2217_v22 }
  0x9d   :  { %v1659_v35 = vsel %vm67_vm5, 1.0, %v2217_v22  ;;  %v1660_v38 = vsel %vm68_vm6, 1.0, %v2217_v22 }
  0x9e   :  { %1829 = vmatmul.mubr.msk.f32.gmra.mrb[2].mxu0 %vm95_vm0, %v1658_v34 }
  0x9f   :  { %v62_v36 = vpop.permute.xlu1 %61  ;;  %1831 = vmatprep.mubr.msk.f32.mxu0 %vm95_vm0, %v1659_v35  ;;  %v59_v37 = vpop.permute.xlu0 %58  ;;  %1860 = vmatpush3.bf16.msra.mxu0 %v2361_v26 }
  0xa0   :  { %vm69_vm7 = vcmp.eq.s32.totalorder %v59_v37, %v38_v24  ;;  %vm70_vm8 = vcmp.eq.s32.totalorder %v62_v36, %v38_v24  ;;  %1861 = vmatprep.subr.bf16.mxu0 %v2217_v22  ;;  %v2402_v37 = vld [vmem:[#allocation2 + $0x41] ss:$0 sm:$0xff] }
  0xa1   :  { %v1661_v39 = vsel %vm69_vm7, 1.0, %v2217_v22  ;;  %v1662_v40 = vsel %vm70_vm8, 1.0, %v2217_v22 }
  0xa2   :  { %1832 = vmatmul.mubr.msk.f32.gmra.mrb[4].mxu0 %vm95_vm0, %v1660_v38 }
  0xa3   :  { %1834 = vmatprep.mubr.msk.f32.mxu0 %vm95_vm0, %v1661_v39  ;;  %1862 = vmatpush3.bf16.msra.mxu0 %v2368_v27 }
  0xa4   :  { %1863 = vmatprep.subr.bf16.mxu0 %v2217_v22 }
  0xa6   :  { %1835 = vmatmul.mubr.msk.f32.gmra.mrb[6].mxu0 %vm95_vm0, %v1662_v40 }
  0xa7   :  { %1865 = vmatprep.mubr.msk.bf16.mxu0 %vm2218_vm9, %v2217_v22  ;;  %1864 = vmatpush3.bf16.msra.mxu0 %v2376_v29 }
  0xa8   :  { %1877 = vmatprep.subr.bf16.mxu0 %v2217_v22 }
 0x16d   :  { %v1827_v42 = vpop.f32.mrb[0].mxu0 }
 0x16e   :  { %v186_v43 = vpop.f32.mrb[1].mxu0 }
 0x16f   :  { %v225_v44 = vpack.c.bf16 %v1827_v42, %v186_v43 }
 0x171   :  { %v1830_v45 = vpop.f32.mrb[2].mxu0  ;;  %1841 = vmatprep.mubr.msk.bf16.mxu1 %vm263_vm10, %v225_v44 }
 0x172   :  { %v196_v46 = vpop.f32.mrb[3].mxu0 }
 0x173   :  { %v226_v48 = vpack.c.bf16 %v1830_v45, %v196_v46 }
 0x175   :  { %v1833_v49 = vpop.f32.mrb[4].mxu0  ;;  %1842 = vmatmul.mubr.msk.bf16.vlgmr.msra.gmra.mrb[0].mxu1 %vm263_vm10, %v226_v48 }
 0x176   :  { %1850 = vmatpush3.bf16.msra.mxu1 %v2310_v47  ;;  %v206_v50 = vpop.f32.mrb[5].mxu0 }
 0x177   :  { %v227_v52 = vpack.c.bf16 %v1833_v49, %v206_v50  ;;  %1851 = vmatprep.subr.bf16.mxu1 %v2217_v22 }
 0x179   :  { %v1836_v53 = vpop.f32.mrb[6].mxu0  ;;  %1845 = vmatprep.mubr.msk.bf16.mxu1 %vm263_vm10, %v227_v52 }
 0x17a   :  { %v216_v54 = vpop.f32.mrb[7].mxu0  ;;  %1852 = vmatpush3.bf16.msra.mxu1 %v2317_v51 }
 0x17b   :  { %v228_v55 = vpack.c.bf16 %v1836_v53, %v216_v54  ;;  %1869 = vmatprep.subr.bf16.mxu1 %v2217_v22 }
 0x17d   :  { %1846 = vmatmul.mubr.msk.bf16.gmra.mrb[4].mxu1 %vm263_vm10, %v228_v55 }
 0x17e   :  { %1853 = vmatprep.mubr.msk.bf16.mxu1 %vm2218_vm9, %v2217_v22 }
 0x185   :  { %1854 = vmatmul.mubr.bf16.vlgmr.msra.gmra.mrb[8].mxu1 %v2216_v0 }
 0x186   :  { %1870 = vmatpush3.bf16.msra.mxu1 %v2310_v47  ;;  %1873 = vmatprep.mubr.msk.bf16.mxu1 %vm2218_vm9, %v2217_v22 }
 0x187   :  { %1871 = vmatprep.subr.bf16.mxu1 %v2217_v22 }
 0x18a   :  { %1872 = vmatpush3.bf16.msra.mxu1 %v2317_v51 }
 0x18b   :  { %1889 = vmatprep.subr.bf16.mxu1 %v2217_v22 }
 0x248   :  { %v1843_v57 = vpop.f32.mrb[0].mxu1 }
 0x249   :  { %v2333_v58 = vadd.f32 %v1843_v57, %v1671_v56  ;;  %v310_v59 = vpop.f32.mrb[1].mxu1 }
 0x24a   :  { %v1844_v60 = vpop.f32.mrb[2].mxu1  ;;  %v311_v8 = vadd.f32 %v1671_v56, %v310_v59 }
 0x24b   :  { %v2335_v61 = vadd.f32 %v1844_v60, %v1671_v56  ;;  %v313_v62 = vpop.f32.mrb[3].mxu1 }
 0x24c   :  { %v2337_v63 = vadd.f32 %v1671_v56, %v313_v62 }
 0x250   :  { %v1847_v0 = vpop.f32.mrb[4].mxu1 }
 0x251   :  { %v2339_v1 = vadd.f32 %v1847_v0, %v1671_v56  ;;  %v326_v2 = vpop.f32.mrb[5].mxu1 }
 0x252   :  { %v2341_v3 = vadd.f32 %v1671_v56, %v326_v2  ;;  %v1848_v4 = vpop.f32.mrb[6].mxu1 }
 0x253   :  { %v2343_v5 = vadd.f32 %v1848_v4, %v1671_v56  ;;  %v329_v6 = vpop.f32.mrb[7].mxu1 }
 0x254   :  { %v2345_v7 = vadd.f32 %v1671_v56, %v329_v6 }
 0x258   :  { %v390_v9 = vpop.f32.mrb[8].mxu1 }
 0x259   :  { %v396_v10 = vadd.f32 %v390_v9, %v311_v8  ;;  %v1855_v11 = vpop.f32.mrb[9].mxu1 }
 0x25a   :  { %v393_v12 = vpop.f32.mrb[10].mxu1 }
 0x25b   :  { %2061 = vtanh.f32 %v396_v10  ;;  %v1856_v13 = vpop.f32.mrb[11].mxu1  ;;  %v1680_v15 = vmul.f32 -1.442695, %v396_v10 }
 0x25d   :  { %2063 = vpow2.f32 %v1680_v15 }
 0x265   :  { %v2062_v14 = vpop.eup %2061 }
 0x266   :  { %406 = vrot.lane.b32.xlu0 %v2062_v14, %s2219_s21 }
 0x267   :  { %v2064_v16 = vpop.eup %2063 }
 0x268   :  { %v400_v17 = vadd.f32 1.0, %v2064_v16 }
 0x26a   :  { %2065 = vrcp.f32 %v400_v17 }
 0x274   :  { %v2066_v18 = vpop.eup %2065 }
 0x275   :  { %v404_v21 = vmul.f32 0.0, %v2066_v18 }
 0x2d8   :  { %v407_v19 = vpop.permute.xlu0 %406 }
 0x2d9   :  { %v409_v20 = vmul.f32 %v2066_v18, %v407_v19 }
 0x2db   :  { %411 = vrot.lane.b32.xlu1 %v409_v20, %s2220_s22 }
 0x34d   :  { %v412_v23 = vpop.permute.xlu1 %411 }
 0x34e   :  { %v2349_v24 = vadd.f32 %v412_v23, %v404_v21 }
 0x350   :  { %2067 = vtanh.f32 %v2349_v24 }
 0x35a   :  { %v2068_v28 = vpop.eup %2067 }
 0x35b   :  { %417 = vrot.lane.b32.xlu0 %v2068_v28, %s2219_s21 }
 0x3cd   :  { %v418_v30 = vpop.permute.xlu0 %417 }
 0x3ce   :  { %v420_v31 = vmul.f32 %v2066_v18, %v418_v30 }
 0x3d0   :  { %v522_v32 = vpack.c.bf16 %v420_v31, %v420_v31  ;;  %422 = vrot.lane.b32.xlu1 %v420_v31, %s2220_s22 }
 0x3d2   :  { %524 = vrot.lane.b32.xlu0 %v522_v32, %s2220_s22 }
 0x442   :  { %v423_v33 = vpop.permute.xlu1 %422 }
 0x443   :  { %v425_v34 = vsel %vm263_vm10, %v423_v33, 0.0 }
 0x444   :  { %v426_v35 = vpack.c.bf16 %v425_v34, %v425_v34  ;;  %v525_v36 = vpop.permute.xlu0 %524 }
 0x445   :  { %1874 = vmatmul.mubr.msk.bf16.vlgmr.msra.gmra.mrb[12].mxu1 %vm263_vm10, %v525_v36 }
 0x446   :  { %1866 = vmatmul.mubr.msk.bf16.vlgmr.msra.gmra.mrb[8].mxu0 %vm95_vm0, %v426_v35  ;;  %1890 = vmatpush3.bf16.msra.mxu1 %v2310_v47 }
 0x447   :  { %1878 = vmatpush3.bf16.msra.mxu0 %v2355_v25  ;;  %1891 = vmatprep.subr.bf16.mxu1 %v2217_v22 }
 0x448   :  { %1879 = vmatprep.subr.bf16.mxu0 %v2217_v22  ;;  %1885 = vmatprep.mubr.msk.bf16.mxu0 %vm2218_vm9, %v2217_v22 }
 0x449   :  { %1893 = vmatprep.mubr.msk.bf16.mxu1 %vm2218_vm9, %v2217_v22 }
 0x44a   :  { %1892 = vmatpush3.bf16.msra.mxu1 %v2317_v51 }
 0x44b   :  { %1880 = vmatpush3.bf16.msra.mxu0 %v2361_v26  ;;  %1897 = vmatprep.subr.bf16.mxu1 %v2217_v22 }
 0x44c   :  { %1881 = vmatprep.subr.bf16.mxu0 %v2217_v22 }
 0x44f   :  { %1882 = vmatpush3.bf16.msra.mxu0 %v2368_v27 }
 0x450   :  { %1883 = vmatprep.subr.bf16.mxu0 %v2217_v22 }
 0x453   :  { %1884 = vmatpush3.bf16.msra.mxu0 %v2376_v29 }
 0x454   :  { %1917 = vmatprep.subr.bf16.mxu0 %v2217_v22 }
 0x518   :  { %v563_v38 = vpop.f32.mrb[12].mxu1 }
 0x519   :  { %v569_v39 = vadd.f32 %v563_v38, %v2337_v63  ;;  %v492_v40 = vpop.f32.mrb[8].mxu0  ;;  %v1875_v41 = vpop.f32.mrb[13].mxu1 }
 0x51a   :  { %v493_v42 = vadd.f32 %v2402_v37, %v492_v40  ;;  %v1867_v43 = vpop.f32.mrb[9].mxu0  ;;  %v566_v44 = vpop.f32.mrb[14].mxu1 }
 0x51b   :  { %2069 = vtanh.f32 %v569_v39  ;;  %v495_v45 = vpop.f32.mrb[10].mxu0  ;;  %v1876_v46 = vpop.f32.mrb[15].mxu1  ;;  %v1689_v52 = vmul.f32 -1.442695, %v569_v39 }
 0x51c   :  { %2071 = vtanh.f32 %v493_v42  ;;  %v1868_v48 = vpop.f32.mrb[11].mxu0  ;;  %v1687_v53 = vmul.f32 -1.442695, %v493_v42 }
 0x51d   :  { %2073 = vpow2.f32 %v1689_v52 }
 0x51e   :  { %2075 = vpow2.f32 %v1687_v53 }
 0x525   :  { %v2070_v49 = vpop.eup %2069 }
 0x526   :  { %v2072_v50 = vpop.eup %2071  ;;  %579 = vrot.lane.b32.xlu0 %v2070_v49, %s2219_s21 }
 0x527   :  { %507 = vrot.lane.b32.xlu1 %v2072_v50, %s2219_s21  ;;  %v2074_v54 = vpop.eup %2073 }
 0x528   :  { %v2076_v55 = vpop.eup %2075  ;;  %v573_v56 = vadd.f32 1.0, %v2074_v54 }
 0x529   :  { %v501_v57 = vadd.f32 1.0, %v2076_v55 }
 0x52a   :  { %2077 = vrcp.f32 %v573_v56 }
 0x52b   :  { %2079 = vrcp.f32 %v501_v57 }
 0x534   :  { %v2078_v59 = vpop.eup %2077 }
 0x535   :  { %v2080_v62 = vpop.eup %2079  ;;  %v577_v4 = vmul.f32 %v2078_v59, %v2349_v24 }
 0x536   :  { %v505_v8 = vmul.f32 0.0, %v2080_v62 }
 0x598   :  { %v580_v60 = vpop.permute.xlu0 %579 }
 0x599   :  { %v582_v63 = vmul.f32 %v2078_v59, %v580_v60  ;;  %v508_v0 = vpop.permute.xlu1 %507 }
 0x59a   :  { %v510_v2 = vmul.f32 %v2080_v62, %v508_v0 }
 0x59b   :  { %584 = vrot.lane.b32.xlu0 %v582_v63, %s2220_s22 }
 0x59c   :  { %512 = vrot.lane.b32.xlu1 %v510_v2, %s2220_s22 }
 0x60d   :  { %v585_v6 = vpop.permute.xlu0 %584 }
 0x60e   :  { %v2411_v9 = vadd.f32 %v585_v6, %v577_v4  ;;  %v513_v10 = vpop.permute.xlu1 %512 }
 0x60f   :  { %v2413_v11 = vadd.f32 %v513_v10, %v505_v8 }
 0x610   :  { %2081 = vtanh.f32 %v2411_v9 }
 0x611   :  { %2083 = vtanh.f32 %v2413_v11 }
 0x61a   :  { %v2082_v12 = vpop.eup %2081 }
 0x61b   :  { %v2084_v13 = vpop.eup %2083  ;;  %590 = vrot.lane.b32.xlu0 %v2082_v12, %s2219_s21 }
 0x61c   :  { %518 = vrot.lane.b32.xlu1 %v2084_v13, %s2219_s21 }
 0x68d   :  { %v591_v14 = vpop.permute.xlu0 %590 }
 0x68e   :  { %v593_v15 = vmul.f32 %v2078_v59, %v591_v14  ;;  %v519_v16 = vpop.permute.xlu1 %518 }
 0x68f   :  { %v521_v17 = vmul.f32 %v2080_v62, %v519_v16 }
 0x690   :  { %595 = vrot.lane.b32.xlu1 %v593_v15, %s2220_s22  ;;  %v671_v18 = vpack.c.bf16 %v593_v15, %v593_v15 }
 0x691   :  { %599 = vrot.lane.b32.xlu0 %v521_v17, %s2219_s21 }
 0x694   :  { %673 = vrot.lane.b32.xlu1 %v671_v18, %s2220_s22 }
 0x702   :  { %v596_v19 = vpop.permute.xlu1 %595 }
 0x703   :  { %v600_v20 = vpop.permute.xlu0 %599 }
 0x704   :  { %v602_v21 = vsel %vm263_vm10, %v596_v19, %v600_v20 }
 0x705   :  { %v603_v23 = vpack.c.bf16 %v602_v21, %v602_v21 }
 0x706   :  { %v674_v24 = vpop.permute.xlu1 %673 }
 0x707   :  { %1886 = vmatmul.mubr.msk.bf16.vlgmr.msra.gmra.mrb[12].mxu0 %vm95_vm0, %v603_v23  ;;  %1894 = vmatmul.mubr.msk.bf16.vlgmr.msra.gmra.mrb[16].mxu1 %vm263_vm10, %v674_v24 }
 0x708   :  { %1898 = vmatpush3.bf16.msra.mxu1 %v2355_v25  ;;  %1905 = vmatprep.mubr.msk.bf16.mxu1 %vm2218_vm9, %v2217_v22 }
 0x709   :  { %1899 = vmatprep.subr.bf16.mxu1 %v2217_v22  ;;  %1918 = vmatpush3.bf16.msra.mxu0 %v2355_v25 }
 0x70a   :  { %1919 = vmatprep.subr.bf16.mxu0 %v2217_v22  ;;  %1925 = vmatprep.mubr.msk.bf16.mxu0 %vm2218_vm9, %v2217_v22 }
 0x70c   :  { %1900 = vmatpush3.bf16.msra.mxu1 %v2361_v26 }
 0x70d   :  { %1901 = vmatprep.subr.bf16.mxu1 %v2217_v22  ;;  %1920 = vmatpush3.bf16.msra.mxu0 %v2361_v26 }
 0x70e   :  { %1921 = vmatprep.subr.bf16.mxu0 %v2217_v22 }
 0x710   :  { %1902 = vmatpush3.bf16.msra.mxu1 %v2368_v27 }
 0x711   :  { %1903 = vmatprep.subr.bf16.mxu1 %v2217_v22  ;;  %1922 = vmatpush3.bf16.msra.mxu0 %v2368_v27 }
 0x712   :  { %1923 = vmatprep.subr.bf16.mxu0 %v2217_v22 }
 0x714   :  { %1904 = vmatpush3.bf16.msra.mxu1 %v2376_v29 }
 0x715   :  { %1909 = vmatprep.subr.bf16.mxu1 %v2217_v22  ;;  %1924 = vmatpush3.bf16.msra.mxu0 %v2376_v29 }
 0x716   :  { %1949 = vmatprep.subr.bf16.mxu0 %v2217_v22 }
 0x7da   :  { %v641_v28 = vpop.f32.mrb[12].mxu0  ;;  %v712_v30 = vpop.f32.mrb[16].mxu1 }
 0x7db   :  { %v642_v31 = vadd.f32 %v2402_v37, %v641_v28  ;;  %v718_v32 = vadd.f32 %v712_v30, %v2333_v58  ;;  %v1887_v33 = vpop.f32.mrb[13].mxu0  ;;  %v1895_v34 = vpop.f32.mrb[17].mxu1 }
 0x7dc   :  { %v644_v35 = vpop.f32.mrb[14].mxu0  ;;  %v715_v36 = vpop.f32.mrb[18].mxu1 }
 0x7dd   :  { %2085 = vtanh.f32 %v642_v31  ;;  %v1888_v38 = vpop.f32.mrb[15].mxu0  ;;  %v1896_v39 = vpop.f32.mrb[19].mxu1  ;;  %v1691_v42 = vmul.f32 -1.442695, %v642_v31  ;;  %v1693_v43 = vmul.f32 -1.442695, %v718_v32 }
 0x7de   :  { %2087 = vtanh.f32 %v718_v32 }
 0x7df   :  { %2089 = vpow2.f32 %v1691_v42 }
 0x7e0   :  { %2091 = vpow2.f32 %v1693_v43 }
 0x7e7   :  { %v2086_v40 = vpop.eup %2085 }
 0x7e8   :  { %v2088_v41 = vpop.eup %2087  ;;  %656 = vrot.lane.b32.xlu0 %v2086_v40, %s2219_s21 }
 0x7e9   :  { %728 = vrot.lane.b32.xlu1 %v2088_v41, %s2219_s21  ;;  %v2090_v44 = vpop.eup %2089 }
 0x7ea   :  { %v2092_v58 = vpop.eup %2091  ;;  %v650_v45 = vadd.f32 1.0, %v2090_v44 }
 0x7eb   :  { %v722_v46 = vadd.f32 1.0, %v2092_v58 }
 0x7ec   :  { %2093 = vrcp.f32 %v650_v45 }
 0x7ed   :  { %2095 = vrcp.f32 %v722_v46 }
 0x7f6   :  { %v2094_v48 = vpop.eup %2093 }
 0x7f7   :  { %v2096_v50 = vpop.eup %2095  ;;  %v654_v55 = vmul.f32 %v2094_v48, %v2413_v11 }
 0x7f8   :  { %v726_v57 = vmul.f32 %v2096_v50, %v2411_v9 }
 0x85a   :  { %v657_v49 = vpop.permute.xlu0 %656 }
 0x85b   :  { %v659_v52 = vmul.f32 %v2094_v48, %v657_v49  ;;  %v729_v53 = vpop.permute.xlu1 %728 }
 0x85c   :  { %v731_v54 = vmul.f32 %v2096_v50, %v729_v53 }
 0x85d   :  { %661 = vrot.lane.b32.xlu0 %v659_v52, %s2220_s22 }
 0x85e   :  { %733 = vrot.lane.b32.xlu1 %v731_v54, %s2220_s22 }
 0x8cf   :  { %v662_v56 = vpop.permute.xlu0 %661 }
 0x8d0   :  { %v2453_v59 = vadd.f32 %v662_v56, %v654_v55  ;;  %v734_v60 = vpop.permute.xlu1 %733 }
 0x8d1   :  { %v2455_v62 = vadd.f32 %v734_v60, %v726_v57 }
 0x8d2   :  { %2097 = vtanh.f32 %v2453_v59 }
 0x8d3   :  { %2099 = vtanh.f32 %v2455_v62 }
 0x8dc   :  { %v2098_v63 = vpop.eup %2097 }
 0x8dd   :  { %v2100_v0 = vpop.eup %2099  ;;  %667 = vrot.lane.b32.xlu0 %v2098_v63, %s2219_s21 }
 0x8de   :  { %739 = vrot.lane.b32.xlu1 %v2100_v0, %s2219_s21 }
 0x94f   :  { %v668_v2 = vpop.permute.xlu0 %667 }
 0x950   :  { %v670_v4 = vmul.f32 %v2094_v48, %v668_v2  ;;  %v740_v6 = vpop.permute.xlu1 %739 }
 0x951   :  { %v742_v8 = vmul.f32 %v2096_v50, %v740_v6 }
 0x952   :  { %748 = vrot.lane.b32.xlu1 %v670_v4, %s2219_s21 }
 0x953   :  { %744 = vrot.lane.b32.xlu0 %v742_v8, %s2220_s22  ;;  %v820_v9 = vpack.c.bf16 %v742_v8, %v742_v8 }
 0x957   :  { %822 = vrot.lane.b32.xlu0 %v820_v9, %s2220_s22 }
 0x9c4   :  { %v749_v10 = vpop.permute.xlu1 %748 }
 0x9c5   :  { %v745_v11 = vpop.permute.xlu0 %744 }
 0x9c6   :  { %v751_v12 = vsel %vm263_vm10, %v745_v11, %v749_v10 }
 0x9c7   :  { %v752_v13 = vpack.c.bf16 %v751_v12, %v751_v12 }
 0x9c9   :  { %1906 = vmatmul.mubr.msk.bf16.vlgmr.msra.gmra.mrb[20].mxu1 %vm95_vm0, %v752_v13  ;;  %v823_v14 = vpop.permute.xlu0 %822 }
 0x9ca   :  { %1910 = vmatpush3.bf16.msra.mxu1 %v2310_v47  ;;  %1913 = vmatprep.mubr.msk.bf16.mxu1 %vm2218_vm9, %v2217_v22 }
 0x9cb   :  { %1911 = vmatprep.subr.bf16.mxu1 %v2217_v22 }
 0x9ce   :  { %1912 = vmatpush3.bf16.msra.mxu1 %v2317_v51 }
 0x9cf   :  { %1929 = vmatprep.subr.bf16.mxu1 %v2217_v22 }
 0x9d1   :  { %1914 = vmatmul.mubr.msk.bf16.vlgmr.msra.gmra.mrb[24].mxu1 %vm263_vm10, %v823_v14 }
 0x9d2   :  { %1930 = vmatpush3.bf16.msra.mxu1 %v2310_v47  ;;  %1933 = vmatprep.mubr.msk.bf16.mxu1 %vm2218_vm9, %v2217_v22 }
 0x9d3   :  { %1931 = vmatprep.subr.bf16.mxu1 %v2217_v22 }
 0x9d6   :  { %1932 = vmatpush3.bf16.msra.mxu1 %v2317_v51 }
 0x9d7   :  { %1937 = vmatprep.subr.bf16.mxu1 %v2217_v22 }
 0xa9c   :  { %v790_v15 = vpop.f32.mrb[20].mxu1 }
 0xa9d   :  { %v791_v16 = vadd.f32 %v2402_v37, %v790_v15  ;;  %v1907_v17 = vpop.f32.mrb[21].mxu1 }
 0xa9e   :  { %v793_v18 = vpop.f32.mrb[22].mxu1 }
 0xa9f   :  { %2101 = vtanh.f32 %v791_v16  ;;  %v1908_v19 = vpop.f32.mrb[23].mxu1  ;;  %v1695_v32 = vmul.f32 -1.442695, %v791_v16 }
 0xaa4   :  { %v861_v20 = vpop.f32.mrb[24].mxu1 }
 0xaa5   :  { %v867_v21 = vadd.f32 %v861_v20, %v2335_v61  ;;  %v1915_v23 = vpop.f32.mrb[25].mxu1 }
 0xaa6   :  { %v864_v24 = vpop.f32.mrb[26].mxu1 }
 0xaa7   :  { %2103 = vtanh.f32 %v867_v21  ;;  %v1916_v28 = vpop.f32.mrb[27].mxu1  ;;  %v1697_v33 = vmul.f32 -1.442695, %v867_v21 }
 0xaa8   :  { %2105 = vpow2.f32 %v1695_v32 }
 0xaa9   :  { %v2102_v30 = vpop.eup %2101  ;;  %2107 = vpow2.f32 %v1697_v33 }
 0xaaa   :  { %805 = vrot.lane.b32.xlu1 %v2102_v30, %s2219_s21 }
 0xab1   :  { %v2104_v31 = vpop.eup %2103 }
 0xab2   :  { %877 = vrot.lane.b32.xlu0 %v2104_v31, %s2219_s21  ;;  %v2106_v34 = vpop.eup %2105 }
 0xab3   :  { %v799_v35 = vadd.f32 1.0, %v2106_v34  ;;  %v2108_v36 = vpop.eup %2107 }
 0xab4   :  { %v871_v38 = vadd.f32 1.0, %v2108_v36 }
 0xab5   :  { %2109 = vrcp.f32 %v799_v35 }
 0xab6   :  { %2111 = vrcp.f32 %v871_v38 }
 0xabf   :  { %v2110_v61 = vpop.eup %2109 }
 0xac0   :  { %v2112_v41 = vpop.eup %2111  ;;  %v803_v44 = vmul.f32 %v2110_v61, %v2453_v59 }
 0xac1   :  { %v875_v46 = vmul.f32 %v2112_v41, %v2455_v62 }
 0xb1c   :  { %v806_v39 = vpop.permute.xlu1 %805 }
 0xb1d   :  { %v808_v40 = vmul.f32 %v2110_v61, %v806_v39 }
 0xb1f   :  { %810 = vrot.lane.b32.xlu1 %v808_v40, %s2220_s22 }
 0xb24   :  { %v878_v42 = vpop.permute.xlu0 %877 }
 0xb25   :  { %v880_v43 = vmul.f32 %v2112_v41, %v878_v42 }
 0xb27   :  { %882 = vrot.lane.b32.xlu0 %v880_v43, %s2220_s22 }
 0xb91   :  { %v811_v58 = vpop.permute.xlu1 %810 }
 0xb92   :  { %v2486_v45 = vadd.f32 %v811_v58, %v803_v44 }
 0xb94   :  { %2113 = vtanh.f32 %v2486_v45 }
 0xb99   :  { %v883_v48 = vpop.permute.xlu0 %882 }
 0xb9a   :  { %v2490_v49 = vadd.f32 %v883_v48, %v875_v46 }
 0xb9c   :  { %2115 = vtanh.f32 %v2490_v49 }
 0xb9e   :  { %v2114_v50 = vpop.eup %2113 }
 0xb9f   :  { %816 = vrot.lane.b32.xlu1 %v2114_v50, %s2219_s21 }
 0xba6   :  { %v2116_v52 = vpop.eup %2115 }
 0xba7   :  { %888 = vrot.lane.b32.xlu0 %v2116_v52, %s2219_s21 }
 0xc11   :  { %v817_v53 = vpop.permute.xlu1 %816 }
 0xc12   :  { %v819_v54 = vmul.f32 %v2110_v61, %v817_v53 }
 0xc14   :  { %897 = vrot.lane.b32.xlu0 %v819_v54, %s2219_s21 }
 0xc19   :  { %v889_v55 = vpop.permute.xlu0 %888 }
 0xc1a   :  { %v891_v56 = vmul.f32 %v2112_v41, %v889_v55 }
 0xc1c   :  { %893 = vrot.lane.b32.xlu1 %v891_v56, %s2220_s22  ;;  %v969_v57 = vpack.c.bf16 %v891_v56, %v891_v56 }
 0xc20   :  { %971 = vrot.lane.b32.xlu1 %v969_v57, %s2220_s22 }
 0xc86   :  { %v898_v59 = vpop.permute.xlu0 %897 }
 0xc8e   :  { %v894_v60 = vpop.permute.xlu1 %893 }
 0xc8f   :  { %v900_v62 = vsel %vm263_vm10, %v894_v60, %v898_v59 }
 0xc90   :  { %v901_v63 = vpack.c.bf16 %v900_v62, %v900_v62 }
 0xc92   :  { %v972_v0 = vpop.permute.xlu1 %971  ;;  %1926 = vmatmul.mubr.msk.bf16.vlgmr.msra.gmra.mrb[16].mxu0 %vm95_vm0, %v901_v63 }
 0xc93   :  { %1934 = vmatmul.mubr.msk.bf16.vlgmr.msra.gmra.mrb[28].mxu1 %vm263_vm10, %v972_v0  ;;  %1950 = vmatpush3.bf16.msra.mxu0 %v2310_v47 }
 0xc94   :  { %1938 = vmatpush3.bf16.msra.mxu1 %v2355_v25  ;;  %1951 = vmatprep.subr.bf16.mxu0 %v2217_v22 }
 0xc95   :  { %1939 = vmatprep.subr.bf16.mxu1 %v2217_v22  ;;  %1945 = vmatprep.mubr.msk.bf16.mxu1 %vm2218_vm9, %v2217_v22 }
 0xc96   :  { %1953 = vmatprep.mubr.msk.bf16.mxu0 %vm2218_vm9, %v2217_v22 }
 0xc97   :  { %1952 = vmatpush3.bf16.msra.mxu0 %v2317_v51 }
 0xc98   :  { %1940 = vmatpush3.bf16.msra.mxu1 %v2361_v26  ;;  %1957 = vmatprep.subr.bf16.mxu0 %v2217_v22 }
 0xc99   :  { %1941 = vmatprep.subr.bf16.mxu1 %v2217_v22 }
 0xc9c   :  { %1942 = vmatpush3.bf16.msra.mxu1 %v2368_v27 }
 0xc9d   :  { %1943 = vmatprep.subr.bf16.mxu1 %v2217_v22 }
 0xca0   :  { %1944 = vmatpush3.bf16.msra.mxu1 %v2376_v29 }
 0xca1   :  { %1969 = vmatprep.subr.bf16.mxu1 %v2217_v22 }
 0xd65   :  { %v939_v2 = vpop.f32.mrb[16].mxu0 }
 0xd66   :  { %v940_v4 = vadd.f32 %v2402_v37, %v939_v2  ;;  %v1927_v6 = vpop.f32.mrb[17].mxu0  ;;  %v1010_v8 = vpop.f32.mrb[28].mxu1 }
 0xd67   :  { %v1016_v9 = vadd.f32 %v1010_v8, %v2341_v3  ;;  %v942_v10 = vpop.f32.mrb[18].mxu0  ;;  %v1935_v11 = vpop.f32.mrb[29].mxu1 }
 0xd68   :  { %2117 = vtanh.f32 %v940_v4  ;;  %v1928_v12 = vpop.f32.mrb[19].mxu0  ;;  %v1013_v13 = vpop.f32.mrb[30].mxu1  ;;  %v1699_v17 = vmul.f32 -1.442695, %v940_v4 }
 0xd69   :  { %2119 = vtanh.f32 %v1016_v9  ;;  %v1936_v14 = vpop.f32.mrb[31].mxu1  ;;  %v1701_v18 = vmul.f32 -1.442695, %v1016_v9 }
 0xd6a   :  { %2121 = vpow2.f32 %v1699_v17 }
 0xd6b   :  { %2123 = vpow2.f32 %v1701_v18 }
 0xd72   :  { %v2118_v15 = vpop.eup %2117 }
 0xd73   :  { %v2120_v16 = vpop.eup %2119  ;;  %954 = vrot.lane.b32.xlu0 %v2118_v15, %s2219_s21 }
 0xd74   :  { %1026 = vrot.lane.b32.xlu1 %v2120_v16, %s2219_s21  ;;  %v2122_v19 = vpop.eup %2121 }
 0xd75   :  { %v2124_v20 = vpop.eup %2123  ;;  %v948_v3 = vadd.f32 1.0, %v2122_v19 }
 0xd76   :  { %v1020_v21 = vadd.f32 1.0, %v2124_v20 }
 0xd77   :  { %2125 = vrcp.f32 %v948_v3 }
 0xd78   :  { %2127 = vrcp.f32 %v1020_v21 }
 0xd81   :  { %v2126_v23 = vpop.eup %2125 }
 0xd82   :  { %v2128_v28 = vpop.eup %2127  ;;  %v952_v33 = vmul.f32 %v2126_v23, %v2486_v45 }
 0xd83   :  { %v1024_v35 = vmul.f32 %v2128_v28, %v2490_v49 }
 0xde5   :  { %v955_v24 = vpop.permute.xlu0 %954 }
 0xde6   :  { %v957_v30 = vmul.f32 %v2126_v23, %v955_v24  ;;  %v1027_v31 = vpop.permute.xlu1 %1026 }
 0xde7   :  { %v1029_v32 = vmul.f32 %v2128_v28, %v1027_v31 }
 0xde8   :  { %959 = vrot.lane.b32.xlu0 %v957_v30, %s2220_s22 }
 0xde9   :  { %1031 = vrot.lane.b32.xlu1 %v1029_v32, %s2220_s22 }
 0xe5a   :  { %v960_v34 = vpop.permute.xlu0 %959 }
 0xe5b   :  { %v2525_v36 = vadd.f32 %v960_v34, %v952_v33  ;;  %v1032_v38 = vpop.permute.xlu1 %1031 }
 0xe5c   :  { %v2527_v61 = vadd.f32 %v1032_v38, %v1024_v35 }
 0xe5d   :  { %2129 = vtanh.f32 %v2525_v36 }
 0xe5e   :  { %2131 = vtanh.f32 %v2527_v61 }
 0xe67   :  { %v2130_v39 = vpop.eup %2129 }
 0xe68   :  { %v2132_v40 = vpop.eup %2131  ;;  %965 = vrot.lane.b32.xlu0 %v2130_v39, %s2219_s21 }
 0xe69   :  { %1037 = vrot.lane.b32.xlu1 %v2132_v40, %s2219_s21 }
 0xeda   :  { %v966_v41 = vpop.permute.xlu0 %965 }
 0xedb   :  { %v968_v42 = vmul.f32 %v2126_v23, %v966_v41  ;;  %v1038_v43 = vpop.permute.xlu1 %1037 }
 0xedc   :  { %v1040_v44 = vmul.f32 %v2128_v28, %v1038_v43 }
 0xedd   :  { %1046 = vrot.lane.b32.xlu1 %v968_v42, %s2219_s21 }
 0xede   :  { %1042 = vrot.lane.b32.xlu0 %v1040_v44, %s2220_s22  ;;  %v1118_v58 = vpack.c.bf16 %v1040_v44, %v1040_v44 }
 0xee2   :  { %1120 = vrot.lane.b32.xlu0 %v1118_v58, %s2220_s22 }
 0xf4f   :  { %v1047_v45 = vpop.permute.xlu1 %1046 }
 0xf50   :  { %v1043_v46 = vpop.permute.xlu0 %1042 }
 0xf51   :  { %v1049_v48 = vsel %vm263_vm10, %v1043_v46, %v1047_v45 }
 0xf52   :  { %v1050_v49 = vpack.c.bf16 %v1049_v48, %v1049_v48 }
 0xf54   :  { %v1121_v50 = vpop.permute.xlu0 %1120  ;;  %1946 = vmatmul.mubr.msk.bf16.vlgmr.msra.gmra.mrb[32].mxu1 %vm95_vm0, %v1050_v49 }
 0xf55   :  { %1954 = vmatmul.mubr.msk.bf16.vlgmr.msra.gmra.mrb[20].mxu0 %vm263_vm10, %v1121_v50  ;;  %1970 = vmatpush3.bf16.msra.mxu1 %v2310_v47 }
 0xf56   :  { %1958 = vmatpush3.bf16.msra.mxu0 %v2355_v25  ;;  %1971 = vmatprep.subr.bf16.mxu1 %v2217_v22 }
 0xf57   :  { %1959 = vmatprep.subr.bf16.mxu0 %v2217_v22  ;;  %1965 = vmatprep.mubr.msk.bf16.mxu0 %vm2218_vm9, %v2217_v22 }
 0xf58   :  { %1973 = vmatprep.mubr.msk.bf16.mxu1 %vm2218_vm9, %v2217_v22 }
 0xf59   :  { %1972 = vmatpush3.bf16.msra.mxu1 %v2317_v51 }
 0xf5a   :  { %1960 = vmatpush3.bf16.msra.mxu0 %v2361_v26  ;;  %1977 = vmatprep.subr.bf16.mxu1 %v2217_v22 }
 0xf5b   :  { %1961 = vmatprep.subr.bf16.mxu0 %v2217_v22 }
 0xf5e   :  { %1962 = vmatpush3.bf16.msra.mxu0 %v2368_v27 }
 0xf5f   :  { %1963 = vmatprep.subr.bf16.mxu0 %v2217_v22 }
 0xf62   :  { %1964 = vmatpush3.bf16.msra.mxu0 %v2376_v29 }
 0xf63   :  { %1989 = vmatprep.subr.bf16.mxu0 %v2217_v22 }
0x1027   :  { %v1088_v52 = vpop.f32.mrb[32].mxu1 }
0x1028   :  { %v1089_v53 = vadd.f32 %v2402_v37, %v1088_v52  ;;  %v1947_v54 = vpop.f32.mrb[33].mxu1  ;;  %v1159_v55 = vpop.f32.mrb[20].mxu0 }
0x1029   :  { %v1165_v56 = vadd.f32 %v1159_v55, %v2345_v7  ;;  %v1091_v57 = vpop.f32.mrb[34].mxu1  ;;  %v1955_v59 = vpop.f32.mrb[21].mxu0 }
0x102a   :  { %2133 = vtanh.f32 %v1089_v53  ;;  %v1948_v60 = vpop.f32.mrb[35].mxu1  ;;  %v1162_v62 = vpop.f32.mrb[22].mxu0  ;;  %v1703_v4 = vmul.f32 -1.442695, %v1089_v53 }
0x102b   :  { %2135 = vtanh.f32 %v1165_v56  ;;  %v1956_v63 = vpop.f32.mrb[23].mxu0  ;;  %v1705_v6 = vmul.f32 -1.442695, %v1165_v56 }
0x102c   :  { %2137 = vpow2.f32 %v1703_v4 }
0x102d   :  { %2139 = vpow2.f32 %v1705_v6 }
0x1034   :  { %v2134_v0 = vpop.eup %2133 }
0x1035   :  { %v2136_v2 = vpop.eup %2135  ;;  %1103 = vrot.lane.b32.xlu1 %v2134_v0, %s2219_s21 }
0x1036   :  { %1175 = vrot.lane.b32.xlu0 %v2136_v2, %s2219_s21  ;;  %v2138_v8 = vpop.eup %2137 }
0x1037   :  { %v2140_v9 = vpop.eup %2139  ;;  %v1097_v7 = vadd.f32 1.0, %v2138_v8 }
0x1038   :  { %v1169_v10 = vadd.f32 1.0, %v2140_v9 }
0x1039   :  { %2141 = vrcp.f32 %v1097_v7 }
0x103a   :  { %2143 = vrcp.f32 %v1169_v10 }
0x1043   :  { %v2142_v11 = vpop.eup %2141 }
0x1044   :  { %v2144_v13 = vpop.eup %2143  ;;  %v1101_v17 = vmul.f32 %v2142_v11, %v2525_v36 }
0x1045   :  { %v1173_v19 = vmul.f32 %v2144_v13, %v2527_v61 }
0x10a7   :  { %v1104_v12 = vpop.permute.xlu1 %1103 }
0x10a8   :  { %v1106_v14 = vmul.f32 %v2142_v11, %v1104_v12  ;;  %v1176_v15 = vpop.permute.xlu0 %1175 }
0x10a9   :  { %v1178_v16 = vmul.f32 %v2144_v13, %v1176_v15 }
0x10aa   :  { %1108 = vrot.lane.b32.xlu1 %v1106_v14, %s2220_s22 }
0x10ab   :  { %1180 = vrot.lane.b32.xlu0 %v1178_v16, %s2220_s22 }
0x111c   :  { %v1109_v18 = vpop.permute.xlu1 %1108 }
0x111d   :  { %v2563_v20 = vadd.f32 %v1109_v18, %v1101_v17  ;;  %v1181_v3 = vpop.permute.xlu0 %1180 }
0x111e   :  { %v2565_v21 = vadd.f32 %v1181_v3, %v1173_v19 }
0x111f   :  { %2145 = vtanh.f32 %v2563_v20 }
0x1120   :  { %2147 = vtanh.f32 %v2565_v21 }
0x1129   :  { %v2146_v23 = vpop.eup %2145 }
0x112a   :  { %v2148_v24 = vpop.eup %2147  ;;  %1114 = vrot.lane.b32.xlu1 %v2146_v23, %s2219_s21 }
0x112b   :  { %1186 = vrot.lane.b32.xlu0 %v2148_v24, %s2219_s21 }
0x119c   :  { %v1115_v28 = vpop.permute.xlu1 %1114 }
0x119d   :  { %v1117_v30 = vmul.f32 %v2142_v11, %v1115_v28  ;;  %v1187_v31 = vpop.permute.xlu0 %1186 }
0x119e   :  { %v1189_v32 = vmul.f32 %v2144_v13, %v1187_v31 }
0x119f   :  { %1195 = vrot.lane.b32.xlu0 %v1117_v30, %s2219_s21 }
0x11a0   :  { %1191 = vrot.lane.b32.xlu1 %v1189_v32, %s2220_s22  ;;  %v1267_v33 = vpack.c.bf16 %v1189_v32, %v1189_v32 }
0x11a4   :  { %1269 = vrot.lane.b32.xlu1 %v1267_v33, %s2220_s22 }
0x1211   :  { %v1196_v34 = vpop.permute.xlu0 %1195 }
0x1212   :  { %v1192_v35 = vpop.permute.xlu1 %1191 }
0x1213   :  { %v1198_v36 = vsel %vm263_vm10, %v1192_v35, %v1196_v34 }
0x1214   :  { %v1199_v38 = vpack.c.bf16 %v1198_v36, %v1198_v36 }
0x1216   :  { %1966 = vmatmul.mubr.msk.bf16.vlgmr.msra.gmra.mrb[24].mxu0 %vm95_vm0, %v1199_v38  ;;  %v1270_v61 = vpop.permute.xlu1 %1269 }
0x1217   :  { %1974 = vmatmul.mubr.msk.bf16.vlgmr.msra.gmra.mrb[36].mxu1 %vm263_vm10, %v1270_v61  ;;  %1990 = vmatpush3.bf16.msra.mxu0 %v2310_v47 }
0x1218   :  { %1978 = vmatpush3.bf16.msra.mxu1 %v2355_v25  ;;  %1991 = vmatprep.subr.bf16.mxu0 %v2217_v22 }
0x1219   :  { %1979 = vmatprep.subr.bf16.mxu1 %v2217_v22  ;;  %1985 = vmatprep.mubr.msk.bf16.mxu1 %vm2218_vm9, %v2217_v22 }
0x121a   :  { %1993 = vmatprep.mubr.msk.bf16.mxu0 %vm2218_vm9, %v2217_v22 }
0x121b   :  { %1992 = vmatpush3.bf16.msra.mxu0 %v2317_v51 }
0x121c   :  { %1980 = vmatpush3.bf16.msra.mxu1 %v2361_v26  ;;  %1997 = vmatprep.subr.bf16.mxu0 %v2217_v22 }
0x121d   :  { %1981 = vmatprep.subr.bf16.mxu1 %v2217_v22 }
0x1220   :  { %1982 = vmatpush3.bf16.msra.mxu1 %v2368_v27 }
0x1221   :  { %1983 = vmatprep.subr.bf16.mxu1 %v2217_v22 }
0x1224   :  { %1984 = vmatpush3.bf16.msra.mxu1 %v2376_v29 }
0x12e9   :  { %v1237_v47 = vpop.f32.mrb[24].mxu0 }
0x12ea   :  { %v1238_v39 = vadd.f32 %v2402_v37, %v1237_v47  ;;  %v1967_v40 = vpop.f32.mrb[25].mxu0  ;;  %v1308_v41 = vpop.f32.mrb[36].mxu1 }
0x12eb   :  { %v1314_v42 = vadd.f32 %v1308_v41, %v2339_v1  ;;  %v1240_v51 = vpop.f32.mrb[26].mxu0  ;;  %v1975_v43 = vpop.f32.mrb[37].mxu1 }
0x12ec   :  { %2149 = vtanh.f32 %v1238_v39  ;;  %v1968_v44 = vpop.f32.mrb[27].mxu0  ;;  %v1311_v58 = vpop.f32.mrb[38].mxu1  ;;  %v1707_v49 = vmul.f32 -1.442695, %v1238_v39 }
0x12ed   :  { %2151 = vtanh.f32 %v1314_v42  ;;  %v1976_v45 = vpop.f32.mrb[39].mxu1  ;;  %v1709_v50 = vmul.f32 -1.442695, %v1314_v42 }
0x12ee   :  { %2153 = vpow2.f32 %v1707_v49 }
0x12ef   :  { %2155 = vpow2.f32 %v1709_v50 }
0x12f6   :  { %v2150_v46 = vpop.eup %2149 }
0x12f7   :  { %v2152_v48 = vpop.eup %2151  ;;  %1252 = vrot.lane.b32.xlu0 %v2150_v46, %s2219_s21 }
0x12f8   :  { %1324 = vrot.lane.b32.xlu1 %v2152_v48, %s2219_s21  ;;  %v2154_v52 = vpop.eup %2153 }
0x12f9   :  { %v2156_v53 = vpop.eup %2155  ;;  %v1246_v1 = vadd.f32 1.0, %v2154_v52 }
0x12fa   :  { %v1318_v54 = vadd.f32 1.0, %v2156_v53 }
0x12fb   :  { %2157 = vrcp.f32 %v1246_v1 }
0x12fc   :  { %2159 = vrcp.f32 %v1318_v54 }
0x1305   :  { %v2158_v55 = vpop.eup %2157 }
0x1306   :  { %v2160_v57 = vpop.eup %2159  ;;  %v1250_v63 = vmul.f32 %v2158_v55, %v2563_v20 }
0x1307   :  { %v1322_v2 = vmul.f32 %v2160_v57, %v2565_v21 }
0x1369   :  { %v1253_v56 = vpop.permute.xlu0 %1252 }
0x136a   :  { %v1255_v59 = vmul.f32 %v2158_v55, %v1253_v56  ;;  %v1325_v60 = vpop.permute.xlu1 %1324 }
0x136b   :  { %v1327_v62 = vmul.f32 %v2160_v57, %v1325_v60 }
0x136c   :  { %1257 = vrot.lane.b32.xlu0 %v1255_v59, %s2220_s22 }
0x136d   :  { %1329 = vrot.lane.b32.xlu1 %v1327_v62, %s2220_s22 }
0x13de   :  { %v1258_v0 = vpop.permute.xlu0 %1257 }
0x13df   :  { %v2600_v4 = vadd.f32 %v1258_v0, %v1250_v63  ;;  %v1330_v6 = vpop.permute.xlu1 %1329 }
0x13e0   :  { %v2602_v8 = vadd.f32 %v1330_v6, %v1322_v2 }
0x13e1   :  { %2161 = vtanh.f32 %v2600_v4 }
0x13e2   :  { %2163 = vtanh.f32 %v2602_v8 }
0x13eb   :  { %v2162_v9 = vpop.eup %2161 }
0x13ec   :  { %v2164_v7 = vpop.eup %2163  ;;  %1263 = vrot.lane.b32.xlu0 %v2162_v9, %s2219_s21 }
0x13ed   :  { %1335 = vrot.lane.b32.xlu1 %v2164_v7, %s2219_s21 }
0x145e   :  { %v1264_v10 = vpop.permute.xlu0 %1263 }
0x145f   :  { %v1266_v11 = vmul.f32 %v2158_v55, %v1264_v10  ;;  %v1336_v12 = vpop.permute.xlu1 %1335 }
0x1460   :  { %v1338_v13 = vmul.f32 %v2160_v57, %v1336_v12  ;;  %v1566_v12 = vld [vmem:[#allocation2 + $0x50] sm:$0xff] }
0x1461   :  { %1344 = vrot.lane.b32.xlu1 %v1266_v11, %s2219_s21  ;;  %v1565_v11 = vld [vmem:[#allocation2 + $0x48] sm:$0xff] }
0x1462   :  { %1340 = vrot.lane.b32.xlu0 %v1338_v13, %s2220_s22  ;;  %v1416_v14 = vpack.c.bf16 %v1338_v13, %v1338_v13  ;;  %v1567_v13 = vld [vmem:[#allocation2 + $0x58] sm:$0xff] }
0x1466   :  { %1418 = vrot.lane.b32.xlu0 %v1416_v14, %s2220_s22  ;;  %v2221_v14 = vmov 0.0|0.0  }
0x1467   :  { %2036 = vmatprep.subr.bf16.mxu1 %v2221_v14 }
0x14d3   :  { %v1345_v15 = vpop.permute.xlu1 %1344 }
0x14d4   :  { %v1341_v16 = vpop.permute.xlu0 %1340 }
0x14d5   :  { %v1347_v17 = vsel %vm263_vm10, %v1341_v16, %v1345_v15  ;;  %v2037_v15 = vpack.c.bf16 %v1566_v12, %v1565_v11  ;;  %v1568_v16 = vld [vmem:[#allocation2 + $0x60] sm:$0xff] }
0x14d6   :  { %v1348_v18 = vpack.c.bf16 %v1347_v17, %v1347_v17  ;;  %v2040_v17 = vpack.c.bf16 %v1568_v16, %v1567_v13 }
0x14d8   :  { %v1419_v19 = vpop.permute.xlu0 %1418  ;;  %1986 = vmatmul.mubr.msk.bf16.vlgmr.msra.gmra.mrb[40].mxu1 %vm95_vm0, %v1348_v18 }
0x14d9   :  { %1994 = vmatmul.mubr.msk.bf16.vlgmr.msra.gmra.mrb[28].mxu0 %vm263_vm10, %v1419_v19  ;;  %2017 = vmatprep.mubr.msk.f32.mxu1 %vm2218_vm9, %v2217_v22 }
0x14da   :  { %1998 = vmatpush3.bf16.msra.mxu0 %v2355_v25  ;;  %2005 = vmatprep.mubr.msk.bf16.mxu0 %vm2218_vm9, %v2217_v22 }
0x14db   :  { %1999 = vmatprep.subr.bf16.mxu0 %v2217_v22  ;;  %2038 = vmatpush3.bf16.msra.mxu1 %v2037_v15 }
0x14dc   :  { %2039 = vmatprep.subr.bf16.mxu1 %v2221_v14 }
0x14de   :  { %2000 = vmatpush3.bf16.msra.mxu0 %v2361_v26 }
0x14df   :  { %2001 = vmatprep.subr.bf16.mxu0 %v2217_v22  ;;  %2041 = vmatpush3.bf16.msra.mxu1 %v2040_v17 }
0x14e2   :  { %2002 = vmatpush3.bf16.msra.mxu0 %v2368_v27 }
0x14e3   :  { %2003 = vmatprep.subr.bf16.mxu0 %v2217_v22 }
0x14e6   :  { %2004 = vmatpush3.bf16.msra.mxu0 %v2376_v29 }
0x15ab   :  { %v1386_v20 = vpop.f32.mrb[40].mxu1 }
0x15ac   :  { %v1387_v3 = vadd.f32 %v2402_v37, %v1386_v20  ;;  %v1987_v21 = vpop.f32.mrb[41].mxu1  ;;  %v1457_v25 = vpop.f32.mrb[28].mxu0 }
0x15ad   :  { %v1463_v23 = vadd.f32 %v1457_v25, %v2343_v5  ;;  %v1389_v24 = vpop.f32.mrb[42].mxu1  ;;  %v1995_v28 = vpop.f32.mrb[29].mxu0  ;;  %v1716_v21 = vld [vmem:[#allocation2 + $0x68] ss:$0 sm:$0xff] }
0x15ae   :  { %2165 = vtanh.f32 %v1387_v3  ;;  %v1988_v30 = vpop.f32.mrb[43].mxu1  ;;  %v1460_v26 = vpop.f32.mrb[30].mxu0  ;;  %v1711_v22 = vmul.f32 -1.442695, %v1387_v3 }
0x15af   :  { %2167 = vtanh.f32 %v1463_v23  ;;  %v1996_v31 = vpop.f32.mrb[31].mxu0  ;;  %v1713_v29 = vmul.f32 -1.442695, %v1463_v23 }
0x15b0   :  { %2169 = vpow2.f32 %v1711_v22 }
0x15b1   :  { %2171 = vpow2.f32 %v1713_v29 }
0x15b8   :  { %v2166_v32 = vpop.eup %2165 }
0x15b9   :  { %v2168_v27 = vpop.eup %2167  ;;  %1401 = vrot.lane.b32.xlu1 %v2166_v32, %s2219_s21 }
0x15ba   :  { %1473 = vrot.lane.b32.xlu0 %v2168_v27, %s2219_s21  ;;  %v2170_v33 = vpop.eup %2169 }
0x15bb   :  { %v2172_v34 = vpop.eup %2171  ;;  %v1395_v5 = vadd.f32 1.0, %v2170_v33 }
0x15bc   :  { %v1467_v35 = vadd.f32 1.0, %v2172_v34 }
0x15bd   :  { %2173 = vrcp.f32 %v1395_v5 }
0x15be   :  { %2175 = vrcp.f32 %v1467_v35 }
0x15c7   :  { %v2174_v36 = vpop.eup %2173 }
0x15c8   :  { %v2176_v61 = vpop.eup %2175  ;;  %v1399_v41 = vmul.f32 %v2174_v36, %v2600_v4 }
0x15c9   :  { %v1471_v51 = vmul.f32 %v2176_v61, %v2602_v8 }
0x162b   :  { %v1402_v38 = vpop.permute.xlu1 %1401 }
0x162c   :  { %v1404_v47 = vmul.f32 %v2174_v36, %v1402_v38  ;;  %v1474_v39 = vpop.permute.xlu0 %1473 }
0x162d   :  { %v1476_v40 = vmul.f32 %v2176_v61, %v1474_v39 }
0x162e   :  { %1406 = vrot.lane.b32.xlu1 %v1404_v47, %s2220_s22 }
0x162f   :  { %1478 = vrot.lane.b32.xlu0 %v1476_v40, %s2220_s22 }
0x16a0   :  { %v1407_v42 = vpop.permute.xlu1 %1406 }
0x16a1   :  { %v1409_v43 = vadd.f32 %v1407_v42, %v1399_v41  ;;  %v1479_v44 = vpop.permute.xlu0 %1478 }
0x16a2   :  { %v1481_v58 = vadd.f32 %v1479_v44, %v1471_v51 }
0x16a3   :  { %2177 = vtanh.f32 %v1409_v43 }
0x16a4   :  { %2179 = vtanh.f32 %v1481_v58 }
0x16ad   :  { %v2178_v45 = vpop.eup %2177 }
0x16ae   :  { %v2180_v46 = vpop.eup %2179  ;;  %1412 = vrot.lane.b32.xlu1 %v2178_v45, %s2219_s21 }
0x16af   :  { %1484 = vrot.lane.b32.xlu0 %v2180_v46, %s2219_s21 }
0x1720   :  { %v1413_v48 = vpop.permute.xlu1 %1412 }
0x1721   :  { %v1415_v49 = vmul.f32 %v2174_v36, %v1413_v48  ;;  %v1485_v50 = vpop.permute.xlu0 %1484 }
0x1722   :  { %v1487_v52 = vmul.f32 %v2176_v61, %v1485_v50 }
0x1723   :  { %1493 = vrot.lane.b32.xlu0 %v1415_v49, %s2219_s21 }
0x1724   :  { %1489 = vrot.lane.b32.xlu1 %v1487_v52, %s2220_s22 }
0x1795   :  { %v1494_v53 = vpop.permute.xlu0 %1493 }
0x1796   :  { %v1490_v1 = vpop.permute.xlu1 %1489 }
0x1797   :  { %v1496_v54 = vsel %vm263_vm10, %v1490_v1, %v1494_v53 }
0x1798   :  { %v1497_v55 = vpack.c.bf16 %v1496_v54, %v1496_v54 }
0x179a   :  { %2006 = vmatmul.mubr.msk.bf16.vlgmr.msra.gmra.mrb[32].mxu0 %vm95_vm0, %v1497_v55 }
0x186d   :  { %v1535_v56 = vpop.f32.mrb[32].mxu0 }
0x186e   :  { %v1536_v57 = vadd.f32 %v2402_v37, %v1535_v56  ;;  %v2007_v59 = vpop.f32.mrb[33].mxu0 }
0x186f   :  { %v1538_v60 = vpop.f32.mrb[34].mxu0 }
0x1870   :  { %2181 = vtanh.f32 %v1536_v57  ;;  %v2008_v62 = vpop.f32.mrb[35].mxu0  ;;  %v1715_v0 = vmul.f32 -1.442695, %v1536_v57 }
0x1872   :  { %2183 = vpow2.f32 %v1715_v0 }
0x187a   :  { %v2182_v63 = vpop.eup %2181 }
0x187b   :  { %1550 = vrot.lane.b32.xlu1 %v2182_v63, %s2219_s21 }
0x187c   :  { %v2184_v2 = vpop.eup %2183 }
0x187d   :  { %v1544_v4 = vadd.f32 1.0, %v2184_v2 }
0x187f   :  { %2185 = vrcp.f32 %v1544_v4 }
0x1889   :  { %v2186_v6 = vpop.eup %2185 }
0x188a   :  { %v1548_v7 = vmul.f32 %v2186_v6, %v1409_v43 }
0x18ed   :  { %v1551_v8 = vpop.permute.xlu1 %1550 }
0x18ee   :  { %v1553_v9 = vmul.f32 %v2186_v6, %v1551_v8 }
0x18f0   :  { %1555 = vrot.lane.b32.xlu0 %v1553_v9, %s2220_s22 }
0x1962   :  { %v1556_v10 = vpop.permute.xlu0 %1555 }
0x1963   :  { %v1558_v37 = vadd.f32 %v1556_v10, %v1548_v7 }
0x1965   :  { %2187 = vtanh.f32 %v1558_v37 }
0x196f   :  { %v2188_v18 = vpop.eup %2187 }
0x1970   :  { %1561 = vrot.lane.b32.xlu1 %v2188_v18, %s2219_s21 }
0x19e2   :  { %v1562_v19 = vpop.permute.xlu1 %1561 }
0x19e3   :  { %v1564_v20 = vmul.f32 %v2186_v6, %v1562_v19 }
0x19e5   :  { %1575 = vrot.lane.b32.xlu0 %v1564_v20, %s2220_s22 }
0x1a57   :  { %v1576_v3 = vpop.permute.xlu0 %1575 }
0x1a58   :  { %2018 = vmatmul.mubr.msk.f32.vlgmr.msra.gmra.mrb[44].mxu1 %vm263_vm10, %v1576_v3 }
0x1b2b   :  { %v1645_v25 = vpop.f32.mrb[44].mxu1 }
0x1b2c   :  { %v1646_v23 = vadd.f32 %v1716_v21, %v1645_v25  ;;  %v2019_v24 = vpop.f32.mrb[45].mxu1 }
0x1b2e   :  { %1649 = vst [vmem:[%s2651_s3] sm:$0xff] %v1646_v23 }
0x1b2f   :  { %1654 = vsyncpa [#allocation3], 1 }

</bundles_post_ra>
